<compile_context>
chip_gen: v5e
topology: v5e:2x2
jax: 0.10.0
libtpu: 0.0.40
codegen_flags: <defaults>
</compile_context>

<pallas_src>
import functools
import math

import jax
import jax.numpy as jnp
from jax.experimental import pallas as pl
from jax.experimental.pallas import tpu as pltpu


# ---------------------------------------------------------------------------
# Pallas kernel: one CrossModalAttention2 forward, `bblk` batch elements per grid step
# ---------------------------------------------------------------------------
def _cross_modal_attention_kernel(q_ref, kv_ref, ln_w_ref, ln_b_ref,
                                  wq_ref, wk_ref, wv_ref,
                                  bq_ref, bk_ref, bv_ref,
                                  wo_ref, bo_ref, wf_ref, bf_ref,
                                  o_ref, w_ref, *, num_heads):
    Bblk, Sq, D = q_ref.shape
    Sk = kv_ref.shape[1]
    H = num_heads
    Dh = D // H
    eps = 1e-5
    scale = 1.0 / math.sqrt(Dh)

    ln_w = ln_w_ref[...]          # (1, D)   shared LayerNorm params (used 3x, as in PyTorch)
    ln_b = ln_b_ref[...]          # (1, D)

    def layer_norm(x):            # x: (M, D); one-pass moments to cut VPU reduction work
        m1 = jnp.mean(x, axis=-1, keepdims=True)
        m2 = jnp.mean(x * x, axis=-1, keepdims=True)
        var = m2 - m1 * m1
        return (x - m1) * jax.lax.rsqrt(var + eps) * ln_w + ln_b

    # Flatten the batch block into the sublane dim for projections / FF / LN.
    q_in = q_ref[...].reshape(Bblk * Sq, D)      # query stream (Zi_1_alpha_beta)
    kv_in = kv_ref[...].reshape(Bblk * Sk, D)    # key/value stream (Zi_1_alpha)

    zq = layer_norm(q_in)
    zk = layer_norm(kv_in)

    w_acc = jnp.zeros((Bblk, Sq, Sk), jnp.float32)
    attn_acc = jnp.zeros((Bblk * Sq, D), jnp.float32)

    # Static unroll over heads. Head selection on the weights is a free leading-axis
    # slice; head outputs are folded through the per-head out-projection slice
    # (wo_ref[h]) so no lane-dim concatenation is needed.
    for h in range(H):
        Qh = (jnp.dot(zq, wq_ref[h], preferred_element_type=jnp.float32)
              + bq_ref[h]) * scale                                     # (Bblk*Sq, Dh)
        Kh = jnp.dot(zk, wk_ref[h], preferred_element_type=jnp.float32) + bk_ref[h]
        Vh = jnp.dot(zk, wv_ref[h], preferred_element_type=jnp.float32) + bv_ref[h]

        Qh = Qh.reshape(Bblk, Sq, Dh)
        Kh = Kh.reshape(Bblk, Sk, Dh)
        Vh = Vh.reshape(Bblk, Sk, Dh)

        s = jnp.einsum('bqd,bkd->bqk', Qh, Kh,
                       preferred_element_type=jnp.float32)             # (Bblk, Sq, Sk)
        m = jnp.max(s, axis=-1, keepdims=True)
        e = jnp.exp(s - m)
        # EUP approximate reciprocal for the softmax denominator (off the VPU slot).
        p = e * pl.reciprocal(jnp.sum(e, axis=-1, keepdims=True), approx=True)

        w_acc = w_acc + p
        ctx = jnp.einsum('bqk,bkd->bqd', p, Vh,
                         preferred_element_type=jnp.float32)           # (Bblk, Sq, Dh)
        attn_acc = attn_acc + jnp.dot(ctx.reshape(Bblk * Sq, Dh), wo_ref[h],
                                      preferred_element_type=jnp.float32)

    # nn.MultiheadAttention default: average attention weights over heads.
    w_ref[...] = w_acc * (1.0 / H)

    attn = attn_acc + bo_ref[...]                 # out_proj bias
    cross = attn + q_in                           # residual w/ un-normalized input
    inter = layer_norm(cross)
    ff = jnp.dot(inter, wf_ref[...], preferred_element_type=jnp.float32) + bf_ref[...]
    final = layer_norm(inter + ff)
    o_ref[...] = final.reshape(Bblk, Sq, D).astype(o_ref.dtype)


# ---------------------------------------------------------------------------
# Batch-block sizing: fit under a conservative VMEM budget (v7x physical VMEM = 64 MiB),
# keep >= 2 grid steps so the "parallel" axis can shard across v7x's two TensorCores.
# ---------------------------------------------------------------------------
def _choose_bblk(B, Sq, Sk, D):
    vmem_budget = 40 * 1024 * 1024
    weight_bytes = 4 * (5 * D * D + 8 * D)                      # resident weights (f32)
    per_b = 4 * (2 * (2 * Sq * D + Sk * D + Sq * Sk)            # double-buffered in/out blocks
                 + 4 * Sq * D + 3 * Sk * D + 2 * Sq * Sk)       # live in-kernel intermediates
    max_bblk = max(1, (vmem_budget - weight_bytes) // max(per_b, 1))
    if B >= 2:
        max_bblk = min(max_bblk, (B + 1) // 2)                  # >= 2 steps for 2 TCs (v7x)
    return int(max(1, min(B, max_bblk)))


# ---------------------------------------------------------------------------
# Wrapper: host-side weight re-layout (one-time) + pallas_call
# ---------------------------------------------------------------------------
def cross_modal_attention(q, kv, params, num_heads):
    """One CrossModalAttention2 forward. q: (B,Sq,D) query stream, kv: (B,Sk,D)."""
    B, Sq, D = q.shape
    Sk = kv.shape[1]
    H = num_heads
    assert D % H == 0, "num_heads must divide input_dim"
    Dh = D // H

    # --- host-side weight re-layout (outside the hot loop) ---
    in_w = params["in_w"]                       # (3D, D), PyTorch packed [Wq; Wk; Wv]
    in_b = params["in_b"].reshape(3 * D)

    def head_w(w):                              # (D, D) PyTorch (out,in) -> (H, D, Dh), y_h = x @ w_h
        return jnp.transpose(w.T.reshape(D, H, Dh), (1, 0, 2))

    wq_h = head_w(in_w[0:D])
    wk_h = head_w(in_w[D:2 * D])
    wv_h = head_w(in_w[2 * D:3 * D])
    bq_h = in_b[0:D].reshape(H, 1, Dh)
    bk_h = in_b[D:2 * D].reshape(H, 1, Dh)
    bv_h = in_b[2 * D:3 * D].reshape(H, 1, Dh)
    wo_h = params["out_w"].T.reshape(H, Dh, D)  # out_proj absorbs the head concat
    bo = params["out_b"].reshape(1, D)
    wf_t = params["ff_w"].T                     # (D, D) pre-transposed: y = x @ wf_t
    bf = params["ff_b"].reshape(1, D)
    ln_w = params["ln_w"].reshape(1, D)
    ln_b = params["ln_b"].reshape(1, D)

    bblk = _choose_bblk(B, Sq, Sk, D)
    n_steps = -(-B // bblk)
    B_pad = n_steps * bblk
    if B_pad != B:
        pad = [(0, B_pad - B), (0, 0), (0, 0)]
        q = jnp.pad(q, pad)
        kv = jnp.pad(kv, pad)

    kernel = functools.partial(_cross_modal_attention_kernel, num_heads=H)

    def rep(shape):                             # replicated (weight) spec
        nd = len(shape)
        return pl.BlockSpec(shape, lambda b, nd=nd: (0,) * nd)

    in_specs = [
        pl.BlockSpec((bblk, Sq, D), lambda b: (b, 0, 0)),
        pl.BlockSpec((bblk, Sk, D), lambda b: (b, 0, 0)),
        rep((1, D)), rep((1, D)),                               # layer_norm weight / bias
        rep((H, D, Dh)), rep((H, D, Dh)), rep((H, D, Dh)),      # per-head Wq / Wk / Wv
        rep((H, 1, Dh)), rep((H, 1, Dh)), rep((H, 1, Dh)),      # per-head bq / bk / bv
        rep((H, Dh, D)), rep((1, D)),                           # per-head out_proj W / bias
        rep((D, D)), rep((1, D)),                               # W_ff weight / bias
    ]
    out_specs = (
        pl.BlockSpec((bblk, Sq, D), lambda b: (b, 0, 0)),
        pl.BlockSpec((bblk, Sq, Sk), lambda b: (b, 0, 0)),
    )
    out_shape = (
        jax.ShapeDtypeStruct((B_pad, Sq, D), q.dtype),
        jax.ShapeDtypeStruct((B_pad, Sq, Sk), jnp.float32),
    )

    out, w = pl.pallas_call(
        kernel,
        grid=(n_steps,),
        in_specs=in_specs,
        out_specs=out_specs,
        out_shape=out_shape,
        compiler_params=pltpu.CompilerParams(
            dimension_semantics=("parallel",),
            vmem_limit_bytes=48 * 1024 * 1024,
        ),
    )(q, kv, ln_w, ln_b, wq_h, wk_h, wv_h, bq_h, bk_h, bv_h, wo_h, bo, wf_t, bf)

    if B_pad != B:
        out = out[:B]
        w = w[:B]
    return out, w


def multimodal_cross_transformer(audio, text, params, num_heads):
    """Mirrors MultimodalCrossTransformer.forward(audio, text)."""
    text_to_audio, ta_w = cross_modal_attention(text, audio, params["text_to_audio"], num_heads)
    audio_to_text, at_w = cross_modal_attention(audio, text, params["audio_to_text"], num_heads)
    attention_scores = {"ta_attention_scores": ta_w, "at_attention_scores": at_w}
    return [text_to_audio, audio_to_text], attention_scores


# ---------------------------------------------------------------------------
# Deterministic parameter init (synthetic, no checkpoint load)
# ---------------------------------------------------------------------------
def init_cma_params(key, input_dim):
    D = input_dim
    ks = jax.random.split(key, 8)
    s = 0.1
    return {
        "ln_w": jnp.ones((1, D), jnp.float32) + s * jax.random.normal(ks[0], (1, D), jnp.float32),
        "ln_b": s * jax.random.normal(ks[1], (1, D), jnp.float32),
        "in_w": s * jax.random.normal(ks[2], (3 * D, D), jnp.float32),
        "in_b": s * jax.random.normal(ks[3], (1, 3 * D), jnp.float32),
        "out_w": s * jax.random.normal(ks[4], (D, D), jnp.float32),
        "out_b": s * jax.random.normal(ks[5], (1, D), jnp.float32),
        "ff_w": s * jax.random.normal(ks[6], (D, D), jnp.float32),
        "ff_b": s * jax.random.normal(ks[7], (1, D), jnp.float32),
    }


# ---------------------------------------------------------------------------
# Pure-JAX reference (for correctness check of the kernel)
# ---------------------------------------------------------------------------
def _cma_ref(q, kv, p, H):
    D = q.shape[-1]
    Dh = D // H

    def ln(x):
        mu = x.mean(-1, keepdims=True)
        var = ((x - mu) ** 2).mean(-1, keepdims=True)
        return (x - mu) / jnp.sqrt(var + 1e-5) * p["ln_w"][0] + p["ln_b"][0]

    zq, zk = ln(q), ln(kv)
    Q = zq @ p["in_w"][:D].T + p["in_b"][0, :D]
    K = zk @ p["in_w"][D:2 * D].T + p["in_b"][0, D:2 * D]
    V = zk @ p["in_w"][2 * D:].T + p["in_b"][0, 2 * D:]
    B, Sq, _ = q.shape
    Sk = kv.shape[1]
    Qh = Q.reshape(B, Sq, H, Dh).transpose(0, 2, 1, 3)
    Kh = K.reshape(B, Sk, H, Dh).transpose(0, 2, 1, 3)
    Vh = V.reshape(B, Sk, H, Dh).transpose(0, 2, 1, 3)
    scores = jnp.einsum("bhqd,bhkd->bhqk", Qh, Kh) / (Dh ** 0.5)
    w = jax.nn.softmax(scores, -1)
    o = jnp.einsum("bhqk,bhkd->bhqd", w, Vh).transpose(0, 2, 1, 3).reshape(B, Sq, D)
    attn = o @ p["out_w"].T + p["out_b"][0]
    cross = attn + q
    inter = ln(cross)
    ff = inter @ p["ff_w"].T + p["ff_b"][0]
    return ln(inter + ff), w.mean(axis=1)


if __name__ == "__main__":
    key = jax.random.PRNGKey(0)
    k_audio, k_text, k_p1, k_p2 = jax.random.split(key, 4)

    B, S_audio, S_text, D, H = 4, 8, 16, 32, 4
    audio = jax.random.normal(k_audio, (B, S_audio, D), jnp.float32)
    text = jax.random.normal(k_text, (B, S_text, D), jnp.float32)

    params = {
        "text_to_audio": init_cma_params(k_p1, D),
        "audio_to_text": init_cma_params(k_p2, D),
    }

    outs, scores = multimodal_cross_transformer(audio, text, params, H)
    jax.block_until_ready(outs)
    jax.block_until_ready(scores)

    # reference check (tolerance accounts for the EUP approx reciprocal in softmax)
    ref_t2a, ref_ta_w = _cma_ref(text, audio, params["text_to_audio"], H)
    ref_a2t, ref_at_w = _cma_ref(audio, text, params["audio_to_text"], H)

    tol = dict(atol=5e-3, rtol=5e-3)
    assert jnp.allclose(outs[0], ref_t2a, **tol)
    assert jnp.allclose(outs[1], ref_a2t, **tol)
    assert jnp.allclose(scores["ta_attention_scores"], ref_ta_w, **tol)
    assert jnp.allclose(scores["at_attention_scores"], ref_at_w, **tol)

    print("KERNEL_OK")
</pallas_src>

<mosaic_0001>
module attributes {stable_mosaic.version = 11 : i64} {
  func.func @_cross_modal_attention_kernel(%arg0: i32, %arg1: memref<2x16x32xf32, #tpu.memory_space<vmem>>, %arg2: memref<2x8x32xf32, #tpu.memory_space<vmem>>, %arg3: memref<1x32xf32, #tpu.memory_space<vmem>>, %arg4: memref<1x32xf32, #tpu.memory_space<vmem>>, %arg5: memref<4x32x8xf32, #tpu.memory_space<vmem>>, %arg6: memref<4x32x8xf32, #tpu.memory_space<vmem>>, %arg7: memref<4x32x8xf32, #tpu.memory_space<vmem>>, %arg8: memref<4x1x8xf32, #tpu.memory_space<vmem>>, %arg9: memref<4x1x8xf32, #tpu.memory_space<vmem>>, %arg10: memref<4x1x8xf32, #tpu.memory_space<vmem>>, %arg11: memref<4x8x32xf32, #tpu.memory_space<vmem>>, %arg12: memref<1x32xf32, #tpu.memory_space<vmem>>, %arg13: memref<32x32xf32, #tpu.memory_space<vmem>>, %arg14: memref<1x32xf32, #tpu.memory_space<vmem>>, %arg15: memref<2x16x32xf32, #tpu.memory_space<vmem>>, %arg16: memref<2x16x8xf32, #tpu.memory_space<vmem>>) attributes {dimension_semantics = [#tpu.dimension_semantics<parallel>], iteration_bounds = array<i64: 2>, scalar_prefetch = 0 : i64, scratch_operands = 0 : i64, tpu.core_type = #tpu.core_type<tc>, window_params = [{transform_indices = @transform_0, window_bounds = array<i64: 2, 16, 32>}, {transform_indices = @transform_1, window_bounds = array<i64: 2, 8, 32>}, {pipeline_mode = #tpu.pipeline_mode<synchronous>, transform_indices = @transform_2, window_bounds = array<i64: 1, 32>}, {pipeline_mode = #tpu.pipeline_mode<synchronous>, transform_indices = @transform_3, window_bounds = array<i64: 1, 32>}, {pipeline_mode = #tpu.pipeline_mode<synchronous>, transform_indices = @transform_4, window_bounds = array<i64: 4, 32, 8>}, {pipeline_mode = #tpu.pipeline_mode<synchronous>, transform_indices = @transform_5, window_bounds = array<i64: 4, 32, 8>}, {pipeline_mode = #tpu.pipeline_mode<synchronous>, transform_indices = @transform_6, window_bounds = array<i64: 4, 32, 8>}, {pipeline_mode = #tpu.pipeline_mode<synchronous>, transform_indices = @transform_7, window_bounds = array<i64: 4, 1, 8>}, {pipeline_mode = #tpu.pipeline_mode<synchronous>, transform_indices = @transform_8, window_bounds = array<i64: 4, 1, 8>}, {pipeline_mode = #tpu.pipeline_mode<synchronous>, transform_indices = @transform_9, window_bounds = array<i64: 4, 1, 8>}, {pipeline_mode = #tpu.pipeline_mode<synchronous>, transform_indices = @transform_10, window_bounds = array<i64: 4, 8, 32>}, {pipeline_mode = #tpu.pipeline_mode<synchronous>, transform_indices = @transform_11, window_bounds = array<i64: 1, 32>}, {pipeline_mode = #tpu.pipeline_mode<synchronous>, transform_indices = @transform_12, window_bounds = array<i64: 32, 32>}, {pipeline_mode = #tpu.pipeline_mode<synchronous>, transform_indices = @transform_13, window_bounds = array<i64: 1, 32>}, {transform_indices = @transform_14, window_bounds = array<i64: 2, 16, 32>}, {transform_indices = @transform_15, window_bounds = array<i64: 2, 16, 8>}]} {
    %c0 = arith.constant 0 : index
    %c0_0 = arith.constant 0 : index
    %0 = vector.load %arg3[%c0, %c0_0] : memref<1x32xf32, #tpu.memory_space<vmem>>, vector<1x32xf32>
    %c0_1 = arith.constant 0 : index
    %c0_2 = arith.constant 0 : index
    %1 = vector.load %arg4[%c0_1, %c0_2] : memref<1x32xf32, #tpu.memory_space<vmem>>, vector<1x32xf32>
    %c0_3 = arith.constant 0 : index
    %c0_4 = arith.constant 0 : index
    %c0_5 = arith.constant 0 : index
    %2 = vector.load %arg1[%c0_3, %c0_4, %c0_5] : memref<2x16x32xf32, #tpu.memory_space<vmem>>, vector<2x16x32xf32>
    %3 = vector.shape_cast %2 : vector<2x16x32xf32> to vector<32x32xf32>
    %c0_6 = arith.constant 0 : index
    %c0_7 = arith.constant 0 : index
    %c0_8 = arith.constant 0 : index
    %4 = vector.load %arg2[%c0_6, %c0_7, %c0_8] : memref<2x8x32xf32, #tpu.memory_space<vmem>>, vector<2x8x32xf32>
    %5 = vector.shape_cast %4 : vector<2x8x32xf32> to vector<16x32xf32>
    %cst = arith.constant dense<0.000000e+00> : vector<32xf32>
    %6 = vector.multi_reduction <add>, %3, %cst [1] : vector<32x32xf32> to vector<32xf32>
    %7 = vector.shape_cast %6 : vector<32xf32> to vector<32x1xf32>
    %cst_9 = arith.constant 3.200000e+01 : f32
    %8 = vector.broadcast %cst_9 : f32 to vector<32x1xf32>
    %9 = arith.divf %7, %8 : vector<32x1xf32>
    %10 = arith.mulf %3, %3 : vector<32x32xf32>
    %cst_10 = arith.constant dense<0.000000e+00> : vector<32xf32>
    %11 = vector.multi_reduction <add>, %10, %cst_10 [1] : vector<32x32xf32> to vector<32xf32>
    %12 = vector.shape_cast %11 : vector<32xf32> to vector<32x1xf32>
    %cst_11 = arith.constant 3.200000e+01 : f32
    %13 = vector.broadcast %cst_11 : f32 to vector<32x1xf32>
    %14 = arith.divf %12, %13 : vector<32x1xf32>
    %15 = arith.mulf %9, %9 : vector<32x1xf32>
    %16 = arith.subf %14, %15 : vector<32x1xf32>
    %17 = vector.broadcast %9 : vector<32x1xf32> to vector<32x32xf32>
    %18 = arith.subf %3, %17 : vector<32x32xf32>
    %cst_12 = arith.constant 9.99999974E-6 : f32
    %19 = vector.broadcast %cst_12 : f32 to vector<32x1xf32>
    %20 = arith.addf %16, %19 : vector<32x1xf32>
    %21 = math.rsqrt %20 : vector<32x1xf32>
    %22 = vector.broadcast %21 : vector<32x1xf32> to vector<32x32xf32>
    %23 = arith.mulf %18, %22 : vector<32x32xf32>
    %24 = vector.broadcast %0 : vector<1x32xf32> to vector<32x32xf32>
    %25 = arith.mulf %23, %24 : vector<32x32xf32>
    %26 = vector.broadcast %1 : vector<1x32xf32> to vector<32x32xf32>
    %27 = arith.addf %25, %26 : vector<32x32xf32>
    %cst_13 = arith.constant dense<0.000000e+00> : vector<16xf32>
    %28 = vector.multi_reduction <add>, %5, %cst_13 [1] : vector<16x32xf32> to vector<16xf32>
    %29 = vector.shape_cast %28 : vector<16xf32> to vector<16x1xf32>
    %cst_14 = arith.constant 3.200000e+01 : f32
    %30 = vector.broadcast %cst_14 : f32 to vector<16x1xf32>
    %31 = arith.divf %29, %30 : vector<16x1xf32>
    %32 = arith.mulf %5, %5 : vector<16x32xf32>
    %cst_15 = arith.constant dense<0.000000e+00> : vector<16xf32>
    %33 = vector.multi_reduction <add>, %32, %cst_15 [1] : vector<16x32xf32> to vector<16xf32>
    %34 = vector.shape_cast %33 : vector<16xf32> to vector<16x1xf32>
    %cst_16 = arith.constant 3.200000e+01 : f32
    %35 = vector.broadcast %cst_16 : f32 to vector<16x1xf32>
    %36 = arith.divf %34, %35 : vector<16x1xf32>
    %37 = arith.mulf %31, %31 : vector<16x1xf32>
    %38 = arith.subf %36, %37 : vector<16x1xf32>
    %39 = vector.broadcast %31 : vector<16x1xf32> to vector<16x32xf32>
    %40 = arith.subf %5, %39 : vector<16x32xf32>
    %cst_17 = arith.constant 9.99999974E-6 : f32
    %41 = vector.broadcast %cst_17 : f32 to vector<16x1xf32>
    %42 = arith.addf %38, %41 : vector<16x1xf32>
    %43 = math.rsqrt %42 : vector<16x1xf32>
    %44 = vector.broadcast %43 : vector<16x1xf32> to vector<16x32xf32>
    %45 = arith.mulf %40, %44 : vector<16x32xf32>
    %46 = vector.broadcast %0 : vector<1x32xf32> to vector<16x32xf32>
    %47 = arith.mulf %45, %46 : vector<16x32xf32>
    %48 = vector.broadcast %1 : vector<1x32xf32> to vector<16x32xf32>
    %49 = arith.addf %47, %48 : vector<16x32xf32>
    %cst_18 = arith.constant 0.000000e+00 : f32
    %50 = vector.broadcast %cst_18 : f32 to vector<2x16x8xf32>
    %cst_19 = arith.constant 0.000000e+00 : f32
    %51 = vector.broadcast %cst_19 : f32 to vector<32x32xf32>
    %c0_20 = arith.constant 0 : index
    %c0_21 = arith.constant 0 : index
    %c0_22 = arith.constant 0 : index
    %52 = vector.load %arg5[%c0_20, %c0_21, %c0_22] : memref<4x32x8xf32, #tpu.memory_space<vmem>>, vector<1x32x8xf32>
    %53 = vector.shape_cast %52 : vector<1x32x8xf32> to vector<32x8xf32>
    %cst_23 = arith.constant dense<0.000000e+00> : vector<32x8xf32>
    %54 = tpu.matmul %27, %53, %cst_23 {dimension_numbers = #tpu.dot_dimension_numbers<[1], [0], [0], [1], [0, 0, 1, 1], [], []>} : vector<32x32xf32>, vector<32x8xf32>, vector<32x8xf32> -> vector<32x8xf32>
    %c0_24 = arith.constant 0 : index
    %c0_25 = arith.constant 0 : index
    %c0_26 = arith.constant 0 : index
    %55 = vector.load %arg8[%c0_24, %c0_25, %c0_26] : memref<4x1x8xf32, #tpu.memory_space<vmem>>, vector<1x1x8xf32>
    %56 = vector.shape_cast %55 : vector<1x1x8xf32> to vector<1x8xf32>
    %57 = vector.broadcast %56 : vector<1x8xf32> to vector<32x8xf32>
    %58 = arith.addf %54, %57 : vector<32x8xf32>
    %cst_27 = arith.constant 0.353553385 : f32
    %59 = vector.broadcast %cst_27 : f32 to vector<32x8xf32>
    %60 = arith.mulf %58, %59 : vector<32x8xf32>
    %c0_28 = arith.constant 0 : index
    %c0_29 = arith.constant 0 : index
    %c0_30 = arith.constant 0 : index
    %61 = vector.load %arg6[%c0_28, %c0_29, %c0_30] : memref<4x32x8xf32, #tpu.memory_space<vmem>>, vector<1x32x8xf32>
    %62 = vector.shape_cast %61 : vector<1x32x8xf32> to vector<32x8xf32>
    %cst_31 = arith.constant dense<0.000000e+00> : vector<16x8xf32>
    %63 = tpu.matmul %49, %62, %cst_31 {dimension_numbers = #tpu.dot_dimension_numbers<[1], [0], [0], [1], [0, 0, 1, 1], [], []>} : vector<16x32xf32>, vector<32x8xf32>, vector<16x8xf32> -> vector<16x8xf32>
    %c0_32 = arith.constant 0 : index
    %c0_33 = arith.constant 0 : index
    %c0_34 = arith.constant 0 : index
    %64 = vector.load %arg9[%c0_32, %c0_33, %c0_34] : memref<4x1x8xf32, #tpu.memory_space<vmem>>, vector<1x1x8xf32>
    %65 = vector.shape_cast %64 : vector<1x1x8xf32> to vector<1x8xf32>
    %66 = vector.broadcast %65 : vector<1x8xf32> to vector<16x8xf32>
    %67 = arith.addf %63, %66 : vector<16x8xf32>
    %c0_35 = arith.constant 0 : index
    %c0_36 = arith.constant 0 : index
    %c0_37 = arith.constant 0 : index
    %68 = vector.load %arg7[%c0_35, %c0_36, %c0_37] : memref<4x32x8xf32, #tpu.memory_space<vmem>>, vector<1x32x8xf32>
    %69 = vector.shape_cast %68 : vector<1x32x8xf32> to vector<32x8xf32>
    %cst_38 = arith.constant dense<0.000000e+00> : vector<16x8xf32>
    %70 = tpu.matmul %49, %69, %cst_38 {dimension_numbers = #tpu.dot_dimension_numbers<[1], [0], [0], [1], [0, 0, 1, 1], [], []>} : vector<16x32xf32>, vector<32x8xf32>, vector<16x8xf32> -> vector<16x8xf32>
    %c0_39 = arith.constant 0 : index
    %c0_40 = arith.constant 0 : index
    %c0_41 = arith.constant 0 : index
    %71 = vector.load %arg10[%c0_39, %c0_40, %c0_41] : memref<4x1x8xf32, #tpu.memory_space<vmem>>, vector<1x1x8xf32>
    %72 = vector.shape_cast %71 : vector<1x1x8xf32> to vector<1x8xf32>
    %73 = vector.broadcast %72 : vector<1x8xf32> to vector<16x8xf32>
    %74 = arith.addf %70, %73 : vector<16x8xf32>
    %75 = vector.shape_cast %60 : vector<32x8xf32> to vector<2x16x8xf32>
    %76 = vector.shape_cast %67 : vector<16x8xf32> to vector<2x8x8xf32>
    %77 = vector.shape_cast %74 : vector<16x8xf32> to vector<2x8x8xf32>
    "tpu.trace_start"() <{level = 10 : i32, message = "bqd,bkd->bqk"}> : () -> ()
    %cst_42 = arith.constant dense<0.000000e+00> : vector<2x16x8xf32>
    %78 = tpu.matmul %75, %76, %cst_42 {dimension_numbers = #tpu.dot_dimension_numbers<[2], [2], [1], [1], [0, 0, 0, 1, 1, 1], [0], [0]>} : vector<2x16x8xf32>, vector<2x8x8xf32>, vector<2x16x8xf32> -> vector<2x16x8xf32>
    "tpu.trace_stop"() : () -> ()
    %cst_43 = arith.constant dense<0xFF800000> : vector<2x16xf32>
    %79 = vector.multi_reduction <maximumf>, %78, %cst_43 [2] : vector<2x16x8xf32> to vector<2x16xf32>
    %80 = vector.shape_cast %79 : vector<2x16xf32> to vector<2x16x1xf32>
    %81 = vector.broadcast %80 : vector<2x16x1xf32> to vector<2x16x8xf32>
    %82 = arith.subf %78, %81 : vector<2x16x8xf32>
    %83 = math.exp %82 : vector<2x16x8xf32>
    %cst_44 = arith.constant dense<0.000000e+00> : vector<2x16xf32>
    %84 = vector.multi_reduction <add>, %83, %cst_44 [2] : vector<2x16x8xf32> to vector<2x16xf32>
    %85 = vector.shape_cast %84 : vector<2x16xf32> to vector<2x16x1xf32>
    %86 = tpu.reciprocal %85 {approx = true} : vector<2x16x1xf32> -> vector<2x16x1xf32>
    %87 = vector.broadcast %86 : vector<2x16x1xf32> to vector<2x16x8xf32>
    %88 = arith.mulf %83, %87 : vector<2x16x8xf32>
    %89 = arith.addf %50, %88 : vector<2x16x8xf32>
    "tpu.trace_start"() <{level = 10 : i32, message = "bqk,bkd->bqd"}> : () -> ()
    %cst_45 = arith.constant dense<0.000000e+00> : vector<2x16x8xf32>
    %90 = tpu.matmul %88, %77, %cst_45 {dimension_numbers = #tpu.dot_dimension_numbers<[2], [1], [1], [2], [0, 0, 0, 1, 1, 2], [0], [0]>} : vector<2x16x8xf32>, vector<2x8x8xf32>, vector<2x16x8xf32> -> vector<2x16x8xf32>
    "tpu.trace_stop"() : () -> ()
    %91 = vector.shape_cast %90 : vector<2x16x8xf32> to vector<32x8xf32>
    %c0_46 = arith.constant 0 : index
    %c0_47 = arith.constant 0 : index
    %c0_48 = arith.constant 0 : index
    %92 = vector.load %arg11[%c0_46, %c0_47, %c0_48] : memref<4x8x32xf32, #tpu.memory_space<vmem>>, vector<1x8x32xf32>
    %93 = vector.shape_cast %92 : vector<1x8x32xf32> to vector<8x32xf32>
    %cst_49 = arith.constant dense<0.000000e+00> : vector<32x32xf32>
    %94 = tpu.matmul %91, %93, %cst_49 {dimension_numbers = #tpu.dot_dimension_numbers<[1], [0], [0], [1], [0, 0, 1, 1], [], []>} : vector<32x8xf32>, vector<8x32xf32>, vector<32x32xf32> -> vector<32x32xf32>
    %95 = arith.addf %51, %94 : vector<32x32xf32>
    %c1 = arith.constant 1 : index
    %c0_50 = arith.constant 0 : index
    %c0_51 = arith.constant 0 : index
    %96 = vector.load %arg5[%c1, %c0_50, %c0_51] : memref<4x32x8xf32, #tpu.memory_space<vmem>>, vector<1x32x8xf32>
    %97 = vector.shape_cast %96 : vector<1x32x8xf32> to vector<32x8xf32>
    %cst_52 = arith.constant dense<0.000000e+00> : vector<32x8xf32>
    %98 = tpu.matmul %27, %97, %cst_52 {dimension_numbers = #tpu.dot_dimension_numbers<[1], [0], [0], [1], [0, 0, 1, 1], [], []>} : vector<32x32xf32>, vector<32x8xf32>, vector<32x8xf32> -> vector<32x8xf32>
    %c1_53 = arith.constant 1 : index
    %c0_54 = arith.constant 0 : index
    %c0_55 = arith.constant 0 : index
    %99 = vector.load %arg8[%c1_53, %c0_54, %c0_55] : memref<4x1x8xf32, #tpu.memory_space<vmem>>, vector<1x1x8xf32>
    %100 = vector.shape_cast %99 : vector<1x1x8xf32> to vector<1x8xf32>
    %101 = vector.broadcast %100 : vector<1x8xf32> to vector<32x8xf32>
    %102 = arith.addf %98, %101 : vector<32x8xf32>
    %cst_56 = arith.constant 0.353553385 : f32
    %103 = vector.broadcast %cst_56 : f32 to vector<32x8xf32>
    %104 = arith.mulf %102, %103 : vector<32x8xf32>
    %c1_57 = arith.constant 1 : index
    %c0_58 = arith.constant 0 : index
    %c0_59 = arith.constant 0 : index
    %105 = vector.load %arg6[%c1_57, %c0_58, %c0_59] : memref<4x32x8xf32, #tpu.memory_space<vmem>>, vector<1x32x8xf32>
    %106 = vector.shape_cast %105 : vector<1x32x8xf32> to vector<32x8xf32>
    %cst_60 = arith.constant dense<0.000000e+00> : vector<16x8xf32>
    %107 = tpu.matmul %49, %106, %cst_60 {dimension_numbers = #tpu.dot_dimension_numbers<[1], [0], [0], [1], [0, 0, 1, 1], [], []>} : vector<16x32xf32>, vector<32x8xf32>, vector<16x8xf32> -> vector<16x8xf32>
    %c1_61 = arith.constant 1 : index
    %c0_62 = arith.constant 0 : index
    %c0_63 = arith.constant 0 : index
    %108 = vector.load %arg9[%c1_61, %c0_62, %c0_63] : memref<4x1x8xf32, #tpu.memory_space<vmem>>, vector<1x1x8xf32>
    %109 = vector.shape_cast %108 : vector<1x1x8xf32> to vector<1x8xf32>
    %110 = vector.broadcast %109 : vector<1x8xf32> to vector<16x8xf32>
    %111 = arith.addf %107, %110 : vector<16x8xf32>
    %c1_64 = arith.constant 1 : index
    %c0_65 = arith.constant 0 : index
    %c0_66 = arith.constant 0 : index
    %112 = vector.load %arg7[%c1_64, %c0_65, %c0_66] : memref<4x32x8xf32, #tpu.memory_space<vmem>>, vector<1x32x8xf32>
    %113 = vector.shape_cast %112 : vector<1x32x8xf32> to vector<32x8xf32>
    %cst_67 = arith.constant dense<0.000000e+00> : vector<16x8xf32>
    %114 = tpu.matmul %49, %113, %cst_67 {dimension_numbers = #tpu.dot_dimension_numbers<[1], [0], [0], [1], [0, 0, 1, 1], [], []>} : vector<16x32xf32>, vector<32x8xf32>, vector<16x8xf32> -> vector<16x8xf32>
    %c1_68 = arith.constant 1 : index
    %c0_69 = arith.constant 0 : index
    %c0_70 = arith.constant 0 : index
    %115 = vector.load %arg10[%c1_68, %c0_69, %c0_70] : memref<4x1x8xf32, #tpu.memory_space<vmem>>, vector<1x1x8xf32>
    %116 = vector.shape_cast %115 : vector<1x1x8xf32> to vector<1x8xf32>
    %117 = vector.broadcast %116 : vector<1x8xf32> to vector<16x8xf32>
    %118 = arith.addf %114, %117 : vector<16x8xf32>
    %119 = vector.shape_cast %104 : vector<32x8xf32> to vector<2x16x8xf32>
    %120 = vector.shape_cast %111 : vector<16x8xf32> to vector<2x8x8xf32>
    %121 = vector.shape_cast %118 : vector<16x8xf32> to vector<2x8x8xf32>
    "tpu.trace_start"() <{level = 10 : i32, message = "bqd,bkd->bqk"}> : () -> ()
    %cst_71 = arith.constant dense<0.000000e+00> : vector<2x16x8xf32>
    %122 = tpu.matmul %119, %120, %cst_71 {dimension_numbers = #tpu.dot_dimension_numbers<[2], [2], [1], [1], [0, 0, 0, 1, 1, 1], [0], [0]>} : vector<2x16x8xf32>, vector<2x8x8xf32>, vector<2x16x8xf32> -> vector<2x16x8xf32>
    "tpu.trace_stop"() : () -> ()
    %cst_72 = arith.constant dense<0xFF800000> : vector<2x16xf32>
    %123 = vector.multi_reduction <maximumf>, %122, %cst_72 [2] : vector<2x16x8xf32> to vector<2x16xf32>
    %124 = vector.shape_cast %123 : vector<2x16xf32> to vector<2x16x1xf32>
    %125 = vector.broadcast %124 : vector<2x16x1xf32> to vector<2x16x8xf32>
    %126 = arith.subf %122, %125 : vector<2x16x8xf32>
    %127 = math.exp %126 : vector<2x16x8xf32>
    %cst_73 = arith.constant dense<0.000000e+00> : vector<2x16xf32>
    %128 = vector.multi_reduction <add>, %127, %cst_73 [2] : vector<2x16x8xf32> to vector<2x16xf32>
    %129 = vector.shape_cast %128 : vector<2x16xf32> to vector<2x16x1xf32>
    %130 = tpu.reciprocal %129 {approx = true} : vector<2x16x1xf32> -> vector<2x16x1xf32>
    %131 = vector.broadcast %130 : vector<2x16x1xf32> to vector<2x16x8xf32>
    %132 = arith.mulf %127, %131 : vector<2x16x8xf32>
    %133 = arith.addf %89, %132 : vector<2x16x8xf32>
    "tpu.trace_start"() <{level = 10 : i32, message = "bqk,bkd->bqd"}> : () -> ()
    %cst_74 = arith.constant dense<0.000000e+00> : vector<2x16x8xf32>
    %134 = tpu.matmul %132, %121, %cst_74 {dimension_numbers = #tpu.dot_dimension_numbers<[2], [1], [1], [2], [0, 0, 0, 1, 1, 2], [0], [0]>} : vector<2x16x8xf32>, vector<2x8x8xf32>, vector<2x16x8xf32> -> vector<2x16x8xf32>
    "tpu.trace_stop"() : () -> ()
    %135 = vector.shape_cast %134 : vector<2x16x8xf32> to vector<32x8xf32>
    %c1_75 = arith.constant 1 : index
    %c0_76 = arith.constant 0 : index
    %c0_77 = arith.constant 0 : index
    %136 = vector.load %arg11[%c1_75, %c0_76, %c0_77] : memref<4x8x32xf32, #tpu.memory_space<vmem>>, vector<1x8x32xf32>
    %137 = vector.shape_cast %136 : vector<1x8x32xf32> to vector<8x32xf32>
    %cst_78 = arith.constant dense<0.000000e+00> : vector<32x32xf32>
    %138 = tpu.matmul %135, %137, %cst_78 {dimension_numbers = #tpu.dot_dimension_numbers<[1], [0], [0], [1], [0, 0, 1, 1], [], []>} : vector<32x8xf32>, vector<8x32xf32>, vector<32x32xf32> -> vector<32x32xf32>
    %139 = arith.addf %95, %138 : vector<32x32xf32>
    %c2 = arith.constant 2 : index
    %c0_79 = arith.constant 0 : index
    %c0_80 = arith.constant 0 : index
    %140 = vector.load %arg5[%c2, %c0_79, %c0_80] : memref<4x32x8xf32, #tpu.memory_space<vmem>>, vector<1x32x8xf32>
    %141 = vector.shape_cast %140 : vector<1x32x8xf32> to vector<32x8xf32>
    %cst_81 = arith.constant dense<0.000000e+00> : vector<32x8xf32>
    %142 = tpu.matmul %27, %141, %cst_81 {dimension_numbers = #tpu.dot_dimension_numbers<[1], [0], [0], [1], [0, 0, 1, 1], [], []>} : vector<32x32xf32>, vector<32x8xf32>, vector<32x8xf32> -> vector<32x8xf32>
    %c2_82 = arith.constant 2 : index
    %c0_83 = arith.constant 0 : index
    %c0_84 = arith.constant 0 : index
    %143 = vector.load %arg8[%c2_82, %c0_83, %c0_84] : memref<4x1x8xf32, #tpu.memory_space<vmem>>, vector<1x1x8xf32>
    %144 = vector.shape_cast %143 : vector<1x1x8xf32> to vector<1x8xf32>
    %145 = vector.broadcast %144 : vector<1x8xf32> to vector<32x8xf32>
    %146 = arith.addf %142, %145 : vector<32x8xf32>
    %cst_85 = arith.constant 0.353553385 : f32
    %147 = vector.broadcast %cst_85 : f32 to vector<32x8xf32>
    %148 = arith.mulf %146, %147 : vector<32x8xf32>
    %c2_86 = arith.constant 2 : index
    %c0_87 = arith.constant 0 : index
    %c0_88 = arith.constant 0 : index
    %149 = vector.load %arg6[%c2_86, %c0_87, %c0_88] : memref<4x32x8xf32, #tpu.memory_space<vmem>>, vector<1x32x8xf32>
    %150 = vector.shape_cast %149 : vector<1x32x8xf32> to vector<32x8xf32>
    %cst_89 = arith.constant dense<0.000000e+00> : vector<16x8xf32>
    %151 = tpu.matmul %49, %150, %cst_89 {dimension_numbers = #tpu.dot_dimension_numbers<[1], [0], [0], [1], [0, 0, 1, 1], [], []>} : vector<16x32xf32>, vector<32x8xf32>, vector<16x8xf32> -> vector<16x8xf32>
    %c2_90 = arith.constant 2 : index
    %c0_91 = arith.constant 0 : index
    %c0_92 = arith.constant 0 : index
    %152 = vector.load %arg9[%c2_90, %c0_91, %c0_92] : memref<4x1x8xf32, #tpu.memory_space<vmem>>, vector<1x1x8xf32>
    %153 = vector.shape_cast %152 : vector<1x1x8xf32> to vector<1x8xf32>
    %154 = vector.broadcast %153 : vector<1x8xf32> to vector<16x8xf32>
    %155 = arith.addf %151, %154 : vector<16x8xf32>
    %c2_93 = arith.constant 2 : index
    %c0_94 = arith.constant 0 : index
    %c0_95 = arith.constant 0 : index
    %156 = vector.load %arg7[%c2_93, %c0_94, %c0_95] : memref<4x32x8xf32, #tpu.memory_space<vmem>>, vector<1x32x8xf32>
    %157 = vector.shape_cast %156 : vector<1x32x8xf32> to vector<32x8xf32>
    %cst_96 = arith.constant dense<0.000000e+00> : vector<16x8xf32>
    %158 = tpu.matmul %49, %157, %cst_96 {dimension_numbers = #tpu.dot_dimension_numbers<[1], [0], [0], [1], [0, 0, 1, 1], [], []>} : vector<16x32xf32>, vector<32x8xf32>, vector<16x8xf32> -> vector<16x8xf32>
    %c2_97 = arith.constant 2 : index
    %c0_98 = arith.constant 0 : index
    %c0_99 = arith.constant 0 : index
    %159 = vector.load %arg10[%c2_97, %c0_98, %c0_99] : memref<4x1x8xf32, #tpu.memory_space<vmem>>, vector<1x1x8xf32>
    %160 = vector.shape_cast %159 : vector<1x1x8xf32> to vector<1x8xf32>
    %161 = vector.broadcast %160 : vector<1x8xf32> to vector<16x8xf32>
    %162 = arith.addf %158, %161 : vector<16x8xf32>
    %163 = vector.shape_cast %148 : vector<32x8xf32> to vector<2x16x8xf32>
    %164 = vector.shape_cast %155 : vector<16x8xf32> to vector<2x8x8xf32>
    %165 = vector.shape_cast %162 : vector<16x8xf32> to vector<2x8x8xf32>
    "tpu.trace_start"() <{level = 10 : i32, message = "bqd,bkd->bqk"}> : () -> ()
    %cst_100 = arith.constant dense<0.000000e+00> : vector<2x16x8xf32>
    %166 = tpu.matmul %163, %164, %cst_100 {dimension_numbers = #tpu.dot_dimension_numbers<[2], [2], [1], [1], [0, 0, 0, 1, 1, 1], [0], [0]>} : vector<2x16x8xf32>, vector<2x8x8xf32>, vector<2x16x8xf32> -> vector<2x16x8xf32>
    "tpu.trace_stop"() : () -> ()
    %cst_101 = arith.constant dense<0xFF800000> : vector<2x16xf32>
    %167 = vector.multi_reduction <maximumf>, %166, %cst_101 [2] : vector<2x16x8xf32> to vector<2x16xf32>
    %168 = vector.shape_cast %167 : vector<2x16xf32> to vector<2x16x1xf32>
    %169 = vector.broadcast %168 : vector<2x16x1xf32> to vector<2x16x8xf32>
    %170 = arith.subf %166, %169 : vector<2x16x8xf32>
    %171 = math.exp %170 : vector<2x16x8xf32>
    %cst_102 = arith.constant dense<0.000000e+00> : vector<2x16xf32>
    %172 = vector.multi_reduction <add>, %171, %cst_102 [2] : vector<2x16x8xf32> to vector<2x16xf32>
    %173 = vector.shape_cast %172 : vector<2x16xf32> to vector<2x16x1xf32>
    %174 = tpu.reciprocal %173 {approx = true} : vector<2x16x1xf32> -> vector<2x16x1xf32>
    %175 = vector.broadcast %174 : vector<2x16x1xf32> to vector<2x16x8xf32>
    %176 = arith.mulf %171, %175 : vector<2x16x8xf32>
    %177 = arith.addf %133, %176 : vector<2x16x8xf32>
    "tpu.trace_start"() <{level = 10 : i32, message = "bqk,bkd->bqd"}> : () -> ()
    %cst_103 = arith.constant dense<0.000000e+00> : vector<2x16x8xf32>
    %178 = tpu.matmul %176, %165, %cst_103 {dimension_numbers = #tpu.dot_dimension_numbers<[2], [1], [1], [2], [0, 0, 0, 1, 1, 2], [0], [0]>} : vector<2x16x8xf32>, vector<2x8x8xf32>, vector<2x16x8xf32> -> vector<2x16x8xf32>
    "tpu.trace_stop"() : () -> ()
    %179 = vector.shape_cast %178 : vector<2x16x8xf32> to vector<32x8xf32>
    %c2_104 = arith.constant 2 : index
    %c0_105 = arith.constant 0 : index
    %c0_106 = arith.constant 0 : index
    %180 = vector.load %arg11[%c2_104, %c0_105, %c0_106] : memref<4x8x32xf32, #tpu.memory_space<vmem>>, vector<1x8x32xf32>
    %181 = vector.shape_cast %180 : vector<1x8x32xf32> to vector<8x32xf32>
    %cst_107 = arith.constant dense<0.000000e+00> : vector<32x32xf32>
    %182 = tpu.matmul %179, %181, %cst_107 {dimension_numbers = #tpu.dot_dimension_numbers<[1], [0], [0], [1], [0, 0, 1, 1], [], []>} : vector<32x8xf32>, vector<8x32xf32>, vector<32x32xf32> -> vector<32x32xf32>
    %183 = arith.addf %139, %182 : vector<32x32xf32>
    %c3 = arith.constant 3 : index
    %c0_108 = arith.constant 0 : index
    %c0_109 = arith.constant 0 : index
    %184 = vector.load %arg5[%c3, %c0_108, %c0_109] : memref<4x32x8xf32, #tpu.memory_space<vmem>>, vector<1x32x8xf32>
    %185 = vector.shape_cast %184 : vector<1x32x8xf32> to vector<32x8xf32>
    %cst_110 = arith.constant dense<0.000000e+00> : vector<32x8xf32>
    %186 = tpu.matmul %27, %185, %cst_110 {dimension_numbers = #tpu.dot_dimension_numbers<[1], [0], [0], [1], [0, 0, 1, 1], [], []>} : vector<32x32xf32>, vector<32x8xf32>, vector<32x8xf32> -> vector<32x8xf32>
    %c3_111 = arith.constant 3 : index
    %c0_112 = arith.constant 0 : index
    %c0_113 = arith.constant 0 : index
    %187 = vector.load %arg8[%c3_111, %c0_112, %c0_113] : memref<4x1x8xf32, #tpu.memory_space<vmem>>, vector<1x1x8xf32>
    %188 = vector.shape_cast %187 : vector<1x1x8xf32> to vector<1x8xf32>
    %189 = vector.broadcast %188 : vector<1x8xf32> to vector<32x8xf32>
    %190 = arith.addf %186, %189 : vector<32x8xf32>
    %cst_114 = arith.constant 0.353553385 : f32
    %191 = vector.broadcast %cst_114 : f32 to vector<32x8xf32>
    %192 = arith.mulf %190, %191 : vector<32x8xf32>
    %c3_115 = arith.constant 3 : index
    %c0_116 = arith.constant 0 : index
    %c0_117 = arith.constant 0 : index
    %193 = vector.load %arg6[%c3_115, %c0_116, %c0_117] : memref<4x32x8xf32, #tpu.memory_space<vmem>>, vector<1x32x8xf32>
    %194 = vector.shape_cast %193 : vector<1x32x8xf32> to vector<32x8xf32>
    %cst_118 = arith.constant dense<0.000000e+00> : vector<16x8xf32>
    %195 = tpu.matmul %49, %194, %cst_118 {dimension_numbers = #tpu.dot_dimension_numbers<[1], [0], [0], [1], [0, 0, 1, 1], [], []>} : vector<16x32xf32>, vector<32x8xf32>, vector<16x8xf32> -> vector<16x8xf32>
    %c3_119 = arith.constant 3 : index
    %c0_120 = arith.constant 0 : index
    %c0_121 = arith.constant 0 : index
    %196 = vector.load %arg9[%c3_119, %c0_120, %c0_121] : memref<4x1x8xf32, #tpu.memory_space<vmem>>, vector<1x1x8xf32>
    %197 = vector.shape_cast %196 : vector<1x1x8xf32> to vector<1x8xf32>
    %198 = vector.broadcast %197 : vector<1x8xf32> to vector<16x8xf32>
    %199 = arith.addf %195, %198 : vector<16x8xf32>
    %c3_122 = arith.constant 3 : index
    %c0_123 = arith.constant 0 : index
    %c0_124 = arith.constant 0 : index
    %200 = vector.load %arg7[%c3_122, %c0_123, %c0_124] : memref<4x32x8xf32, #tpu.memory_space<vmem>>, vector<1x32x8xf32>
    %201 = vector.shape_cast %200 : vector<1x32x8xf32> to vector<32x8xf32>
    %cst_125 = arith.constant dense<0.000000e+00> : vector<16x8xf32>
    %202 = tpu.matmul %49, %201, %cst_125 {dimension_numbers = #tpu.dot_dimension_numbers<[1], [0], [0], [1], [0, 0, 1, 1], [], []>} : vector<16x32xf32>, vector<32x8xf32>, vector<16x8xf32> -> vector<16x8xf32>
    %c3_126 = arith.constant 3 : index
    %c0_127 = arith.constant 0 : index
    %c0_128 = arith.constant 0 : index
    %203 = vector.load %arg10[%c3_126, %c0_127, %c0_128] : memref<4x1x8xf32, #tpu.memory_space<vmem>>, vector<1x1x8xf32>
    %204 = vector.shape_cast %203 : vector<1x1x8xf32> to vector<1x8xf32>
    %205 = vector.broadcast %204 : vector<1x8xf32> to vector<16x8xf32>
    %206 = arith.addf %202, %205 : vector<16x8xf32>
    %207 = vector.shape_cast %192 : vector<32x8xf32> to vector<2x16x8xf32>
    %208 = vector.shape_cast %199 : vector<16x8xf32> to vector<2x8x8xf32>
    %209 = vector.shape_cast %206 : vector<16x8xf32> to vector<2x8x8xf32>
    "tpu.trace_start"() <{level = 10 : i32, message = "bqd,bkd->bqk"}> : () -> ()
    %cst_129 = arith.constant dense<0.000000e+00> : vector<2x16x8xf32>
    %210 = tpu.matmul %207, %208, %cst_129 {dimension_numbers = #tpu.dot_dimension_numbers<[2], [2], [1], [1], [0, 0, 0, 1, 1, 1], [0], [0]>} : vector<2x16x8xf32>, vector<2x8x8xf32>, vector<2x16x8xf32> -> vector<2x16x8xf32>
    "tpu.trace_stop"() : () -> ()
    %cst_130 = arith.constant dense<0xFF800000> : vector<2x16xf32>
    %211 = vector.multi_reduction <maximumf>, %210, %cst_130 [2] : vector<2x16x8xf32> to vector<2x16xf32>
    %212 = vector.shape_cast %211 : vector<2x16xf32> to vector<2x16x1xf32>
    %213 = vector.broadcast %212 : vector<2x16x1xf32> to vector<2x16x8xf32>
    %214 = arith.subf %210, %213 : vector<2x16x8xf32>
    %215 = math.exp %214 : vector<2x16x8xf32>
    %cst_131 = arith.constant dense<0.000000e+00> : vector<2x16xf32>
    %216 = vector.multi_reduction <add>, %215, %cst_131 [2] : vector<2x16x8xf32> to vector<2x16xf32>
    %217 = vector.shape_cast %216 : vector<2x16xf32> to vector<2x16x1xf32>
    %218 = tpu.reciprocal %217 {approx = true} : vector<2x16x1xf32> -> vector<2x16x1xf32>
    %219 = vector.broadcast %218 : vector<2x16x1xf32> to vector<2x16x8xf32>
    %220 = arith.mulf %215, %219 : vector<2x16x8xf32>
    %221 = arith.addf %177, %220 : vector<2x16x8xf32>
    "tpu.trace_start"() <{level = 10 : i32, message = "bqk,bkd->bqd"}> : () -> ()
    %cst_132 = arith.constant dense<0.000000e+00> : vector<2x16x8xf32>
    %222 = tpu.matmul %220, %209, %cst_132 {dimension_numbers = #tpu.dot_dimension_numbers<[2], [1], [1], [2], [0, 0, 0, 1, 1, 2], [0], [0]>} : vector<2x16x8xf32>, vector<2x8x8xf32>, vector<2x16x8xf32> -> vector<2x16x8xf32>
    "tpu.trace_stop"() : () -> ()
    %223 = vector.shape_cast %222 : vector<2x16x8xf32> to vector<32x8xf32>
    %c3_133 = arith.constant 3 : index
    %c0_134 = arith.constant 0 : index
    %c0_135 = arith.constant 0 : index
    %224 = vector.load %arg11[%c3_133, %c0_134, %c0_135] : memref<4x8x32xf32, #tpu.memory_space<vmem>>, vector<1x8x32xf32>
    %225 = vector.shape_cast %224 : vector<1x8x32xf32> to vector<8x32xf32>
    %cst_136 = arith.constant dense<0.000000e+00> : vector<32x32xf32>
    %226 = tpu.matmul %223, %225, %cst_136 {dimension_numbers = #tpu.dot_dimension_numbers<[1], [0], [0], [1], [0, 0, 1, 1], [], []>} : vector<32x8xf32>, vector<8x32xf32>, vector<32x32xf32> -> vector<32x32xf32>
    %227 = arith.addf %183, %226 : vector<32x32xf32>
    %cst_137 = arith.constant 2.500000e-01 : f32
    %228 = vector.broadcast %cst_137 : f32 to vector<2x16x8xf32>
    %229 = arith.mulf %221, %228 : vector<2x16x8xf32>
    %c0_138 = arith.constant 0 : index
    %c0_139 = arith.constant 0 : index
    %c0_140 = arith.constant 0 : index
    %230 = vector.load %arg16[%c0_138, %c0_139, %c0_140] : memref<2x16x8xf32, #tpu.memory_space<vmem>>, vector<2x16x8xf32>
    tpu.vector_store %arg16[%c0_138, %c0_139, %c0_140], %229 {strides = array<i32>} : memref<2x16x8xf32, #tpu.memory_space<vmem>>, vector<2x16x8xf32>,
    %c0_141 = arith.constant 0 : index
    %c0_142 = arith.constant 0 : index
    %231 = vector.load %arg12[%c0_141, %c0_142] : memref<1x32xf32, #tpu.memory_space<vmem>>, vector<1x32xf32>
    %232 = vector.broadcast %231 : vector<1x32xf32> to vector<32x32xf32>
    %233 = arith.addf %227, %232 : vector<32x32xf32>
    %234 = arith.addf %233, %3 : vector<32x32xf32>
    %cst_143 = arith.constant dense<0.000000e+00> : vector<32xf32>
    %235 = vector.multi_reduction <add>, %234, %cst_143 [1] : vector<32x32xf32> to vector<32xf32>
    %236 = vector.shape_cast %235 : vector<32xf32> to vector<32x1xf32>
    %cst_144 = arith.constant 3.200000e+01 : f32
    %237 = vector.broadcast %cst_144 : f32 to vector<32x1xf32>
    %238 = arith.divf %236, %237 : vector<32x1xf32>
    %239 = arith.mulf %234, %234 : vector<32x32xf32>
    %cst_145 = arith.constant dense<0.000000e+00> : vector<32xf32>
    %240 = vector.multi_reduction <add>, %239, %cst_145 [1] : vector<32x32xf32> to vector<32xf32>
    %241 = vector.shape_cast %240 : vector<32xf32> to vector<32x1xf32>
    %cst_146 = arith.constant 3.200000e+01 : f32
    %242 = vector.broadcast %cst_146 : f32 to vector<32x1xf32>
    %243 = arith.divf %241, %242 : vector<32x1xf32>
    %244 = arith.mulf %238, %238 : vector<32x1xf32>
    %245 = arith.subf %243, %244 : vector<32x1xf32>
    %246 = vector.broadcast %238 : vector<32x1xf32> to vector<32x32xf32>
    %247 = arith.subf %234, %246 : vector<32x32xf32>
    %cst_147 = arith.constant 9.99999974E-6 : f32
    %248 = vector.broadcast %cst_147 : f32 to vector<32x1xf32>
    %249 = arith.addf %245, %248 : vector<32x1xf32>
    %250 = math.rsqrt %249 : vector<32x1xf32>
    %251 = vector.broadcast %250 : vector<32x1xf32> to vector<32x32xf32>
    %252 = arith.mulf %247, %251 : vector<32x32xf32>
    %253 = vector.broadcast %0 : vector<1x32xf32> to vector<32x32xf32>
    %254 = arith.mulf %252, %253 : vector<32x32xf32>
    %255 = vector.broadcast %1 : vector<1x32xf32> to vector<32x32xf32>
    %256 = arith.addf %254, %255 : vector<32x32xf32>
    %c0_148 = arith.constant 0 : index
    %c0_149 = arith.constant 0 : index
    %257 = vector.load %arg13[%c0_148, %c0_149] : memref<32x32xf32, #tpu.memory_space<vmem>>, vector<32x32xf32>
    %cst_150 = arith.constant dense<0.000000e+00> : vector<32x32xf32>
    %258 = tpu.matmul %256, %257, %cst_150 {dimension_numbers = #tpu.dot_dimension_numbers<[1], [0], [0], [1], [0, 0, 1, 1], [], []>} : vector<32x32xf32>, vector<32x32xf32>, vector<32x32xf32> -> vector<32x32xf32>
    %c0_151 = arith.constant 0 : index
    %c0_152 = arith.constant 0 : index
    %259 = vector.load %arg14[%c0_151, %c0_152] : memref<1x32xf32, #tpu.memory_space<vmem>>, vector<1x32xf32>
    %260 = vector.broadcast %259 : vector<1x32xf32> to vector<32x32xf32>
    %261 = arith.addf %258, %260 : vector<32x32xf32>
    %262 = arith.addf %256, %261 : vector<32x32xf32>
    %cst_153 = arith.constant dense<0.000000e+00> : vector<32xf32>
    %263 = vector.multi_reduction <add>, %262, %cst_153 [1] : vector<32x32xf32> to vector<32xf32>
    %264 = vector.shape_cast %263 : vector<32xf32> to vector<32x1xf32>
    %cst_154 = arith.constant 3.200000e+01 : f32
    %265 = vector.broadcast %cst_154 : f32 to vector<32x1xf32>
    %266 = arith.divf %264, %265 : vector<32x1xf32>
    %267 = arith.mulf %262, %262 : vector<32x32xf32>
    %cst_155 = arith.constant dense<0.000000e+00> : vector<32xf32>
    %268 = vector.multi_reduction <add>, %267, %cst_155 [1] : vector<32x32xf32> to vector<32xf32>
    %269 = vector.shape_cast %268 : vector<32xf32> to vector<32x1xf32>
    %cst_156 = arith.constant 3.200000e+01 : f32
    %270 = vector.broadcast %cst_156 : f32 to vector<32x1xf32>
    %271 = arith.divf %269, %270 : vector<32x1xf32>
    %272 = arith.mulf %266, %266 : vector<32x1xf32>
    %273 = arith.subf %271, %272 : vector<32x1xf32>
    %274 = vector.broadcast %266 : vector<32x1xf32> to vector<32x32xf32>
    %275 = arith.subf %262, %274 : vector<32x32xf32>
    %cst_157 = arith.constant 9.99999974E-6 : f32
    %276 = vector.broadcast %cst_157 : f32 to vector<32x1xf32>
    %277 = arith.addf %273, %276 : vector<32x1xf32>
    %278 = math.rsqrt %277 : vector<32x1xf32>
    %279 = vector.broadcast %278 : vector<32x1xf32> to vector<32x32xf32>
    %280 = arith.mulf %275, %279 : vector<32x32xf32>
    %281 = vector.broadcast %0 : vector<1x32xf32> to vector<32x32xf32>
    %282 = arith.mulf %280, %281 : vector<32x32xf32>
    %283 = vector.broadcast %1 : vector<1x32xf32> to vector<32x32xf32>
    %284 = arith.addf %282, %283 : vector<32x32xf32>
    %285 = vector.shape_cast %284 : vector<32x32xf32> to vector<2x16x32xf32>
    %c0_158 = arith.constant 0 : index
    %c0_159 = arith.constant 0 : index
    %c0_160 = arith.constant 0 : index
    %286 = vector.load %arg15[%c0_158, %c0_159, %c0_160] : memref<2x16x32xf32, #tpu.memory_space<vmem>>, vector<2x16x32xf32>
    tpu.vector_store %arg15[%c0_158, %c0_159, %c0_160], %285 {strides = array<i32>} : memref<2x16x32xf32, #tpu.memory_space<vmem>>, vector<2x16x32xf32>,
    return
  }
  func.func @transform_0(%arg0: i32) -> (i32, i32, i32) {
    %c0_i32 = arith.constant 0 : i32
    %c0_i32_0 = arith.constant 0 : i32
    %c0_i32_1 = arith.constant 0 : i32
    return %arg0, %c0_i32, %c0_i32_0 : i32, i32, i32
  }
  func.func @transform_1(%arg0: i32) -> (i32, i32, i32) {
    %c0_i32 = arith.constant 0 : i32
    %c0_i32_0 = arith.constant 0 : i32
    %c0_i32_1 = arith.constant 0 : i32
    return %arg0, %c0_i32, %c0_i32_0 : i32, i32, i32
  }
  func.func @transform_2(%arg0: i32) -> (i32, i32) {
    %c0_i32 = arith.constant 0 : i32
    %c0_i32_0 = arith.constant 0 : i32
    %c0_i32_1 = arith.constant 0 : i32
    return %c0_i32, %c0_i32_0 : i32, i32
  }
  func.func @transform_3(%arg0: i32) -> (i32, i32) {
    %c0_i32 = arith.constant 0 : i32
    %c0_i32_0 = arith.constant 0 : i32
    %c0_i32_1 = arith.constant 0 : i32
    return %c0_i32, %c0_i32_0 : i32, i32
  }
  func.func @transform_4(%arg0: i32) -> (i32, i32, i32) {
    %c0_i32 = arith.constant 0 : i32
    %c0_i32_0 = arith.constant 0 : i32
    %c0_i32_1 = arith.constant 0 : i32
    %c0_i32_2 = arith.constant 0 : i32
    return %c0_i32, %c0_i32_0, %c0_i32_1 : i32, i32, i32
  }
  func.func @transform_5(%arg0: i32) -> (i32, i32, i32) {
    %c0_i32 = arith.constant 0 : i32
    %c0_i32_0 = arith.constant 0 : i32
    %c0_i32_1 = arith.constant 0 : i32
    %c0_i32_2 = arith.constant 0 : i32
    return %c0_i32, %c0_i32_0, %c0_i32_1 : i32, i32, i32
  }
  func.func @transform_6(%arg0: i32) -> (i32, i32, i32) {
    %c0_i32 = arith.constant 0 : i32
    %c0_i32_0 = arith.constant 0 : i32
    %c0_i32_1 = arith.constant 0 : i32
    %c0_i32_2 = arith.constant 0 : i32
    return %c0_i32, %c0_i32_0, %c0_i32_1 : i32, i32, i32
  }
  func.func @transform_7(%arg0: i32) -> (i32, i32, i32) {
    %c0_i32 = arith.constant 0 : i32
    %c0_i32_0 = arith.constant 0 : i32
    %c0_i32_1 = arith.constant 0 : i32
    %c0_i32_2 = arith.constant 0 : i32
    return %c0_i32, %c0_i32_0, %c0_i32_1 : i32, i32, i32
  }
  func.func @transform_8(%arg0: i32) -> (i32, i32, i32) {
    %c0_i32 = arith.constant 0 : i32
    %c0_i32_0 = arith.constant 0 : i32
    %c0_i32_1 = arith.constant 0 : i32
    %c0_i32_2 = arith.constant 0 : i32
    return %c0_i32, %c0_i32_0, %c0_i32_1 : i32, i32, i32
  }
  func.func @transform_9(%arg0: i32) -> (i32, i32, i32) {
    %c0_i32 = arith.constant 0 : i32
    %c0_i32_0 = arith.constant 0 : i32
    %c0_i32_1 = arith.constant 0 : i32
    %c0_i32_2 = arith.constant 0 : i32
    return %c0_i32, %c0_i32_0, %c0_i32_1 : i32, i32, i32
  }
  func.func @transform_10(%arg0: i32) -> (i32, i32, i32) {
    %c0_i32 = arith.constant 0 : i32
    %c0_i32_0 = arith.constant 0 : i32
    %c0_i32_1 = arith.constant 0 : i32
    %c0_i32_2 = arith.constant 0 : i32
    return %c0_i32, %c0_i32_0, %c0_i32_1 : i32, i32, i32
  }
  func.func @transform_11(%arg0: i32) -> (i32, i32) {
    %c0_i32 = arith.constant 0 : i32
    %c0_i32_0 = arith.constant 0 : i32
    %c0_i32_1 = arith.constant 0 : i32
    return %c0_i32, %c0_i32_0 : i32, i32
  }
  func.func @transform_12(%arg0: i32) -> (i32, i32) {
    %c0_i32 = arith.constant 0 : i32
    %c0_i32_0 = arith.constant 0 : i32
    %c0_i32_1 = arith.constant 0 : i32
    return %c0_i32, %c0_i32_0 : i32, i32
  }
  func.func @transform_13(%arg0: i32) -> (i32, i32) {
    %c0_i32 = arith.constant 0 : i32
    %c0_i32_0 = arith.constant 0 : i32
    %c0_i32_1 = arith.constant 0 : i32
    return %c0_i32, %c0_i32_0 : i32, i32
  }
  func.func @transform_14(%arg0: i32) -> (i32, i32, i32) {
    %c0_i32 = arith.constant 0 : i32
    %c0_i32_0 = arith.constant 0 : i32
    %c0_i32_1 = arith.constant 0 : i32
    return %arg0, %c0_i32, %c0_i32_0 : i32, i32, i32
  }
  func.func @transform_15(%arg0: i32) -> (i32, i32, i32) {
    %c0_i32 = arith.constant 0 : i32
    %c0_i32_0 = arith.constant 0 : i32
    %c0_i32_1 = arith.constant 0 : i32
    return %arg0, %c0_i32, %c0_i32_0 : i32, i32, i32
  }
}

</mosaic_0001>

<bundles_post_ra>
// kernel: tpu_custom_call.1
= control target key start
LH: loop header
LB: loop body
LE: loop exit
PB: predicated region body
PF: predicated region fallthrough
CT: control target
= control target key end

     0   :  { %s3711_s0 = inlined_call_operand.vmem [shape: f32[4,16,32], index: 0, kind: input, shape index: {}]   ;;  %s3712_s1 = inlined_call_operand.vmem [shape: f32[4,8,32], index: 1, kind: input, shape index: {}]   ;;  %s3713_s2 = inlined_call_operand.vmem [shape: f32[1,32], index: 2, kind: input, shape index: {}]   ;;  %s3714_s3 = inlined_call_operand.vmem [shape: f32[1,32], index: 3, kind: input, shape index: {}]   ;;  %s3715_s4 = inlined_call_operand.vmem [shape: f32[4,32,8], index: 4, kind: input, shape index: {}]   ;;  %s3716_s5 = inlined_call_operand.vmem [shape: f32[4,32,8], index: 5, kind: input, shape index: {}]   ;;  %s3717_s6 = inlined_call_operand.vmem [shape: f32[4,32,8], index: 6, kind: input, shape index: {}]   ;;  %s3718_s7 = inlined_call_operand.vmem [shape: f32[4,1,8], index: 7, kind: input, shape index: {}]   ;;  %s3719_s8 = inlined_call_operand.vmem [shape: f32[4,1,8], index: 8, kind: input, shape index: {}]   ;;  %s3720_s9 = inlined_call_operand.vmem [shape: f32[4,1,8], index: 9, kind: input, shape index: {}]   ;;  %s3721_s10 = inlined_call_operand.vmem [shape: f32[4,8,32], index: 10, kind: input, shape index: {}]   ;;  %s3722_s11 = inlined_call_operand.vmem [shape: f32[1,32], index: 11, kind: input, shape index: {}]   ;;  %s3723_s12 = inlined_call_operand.vmem [shape: f32[32,32], index: 12, kind: input, shape index: {}]   ;;  %s3724_s13 = inlined_call_operand.vmem [shape: f32[1,32], index: 13, kind: input, shape index: {}]   ;;  %s3725_s14 = inlined_call_operand.hbm [shape: f32[4,16,32], index: 14, kind: output, shape index: {0}]   ;;  %s3726_s15 = inlined_call_operand.vmem [shape: f32[4,16,8], index: 15, kind: output, shape index: {1}]  }
   0x1   :  { %3732 = sst [smem:[#allocation9_spill]] %s3711_s0 }
   0x2   :  { %3733 = sst [smem:[#allocation10_spill]] %s3712_s1 }
   0x3   :  { %21 = vsyncpa [#allocation3], 0 }
   0x4   :  { %23 = vsyncpa [#allocation3 + $0x1], 0  ;;  %s2911_s18 = smov 0   ;;  %s2913_s19 = smov 0  }
   0x5   :  { %s2915_s20 = smov 0   ;;  %s2917_s21 = smov 0  }
   0x6 LB: > { %3734 = sst [smem:[#allocation5_spill]] %s2822_s20  ;;  %s2932_s22 = sadd.s32 4294967295, %s2826_s21   ;;  %s2826_s21 = sphi %s2917_s21, %s3744_s21   ;;  %s2822_s20 = sphi %s2915_s20, %s3746_s20   ;;  %s2818_s19 = sphi %s2913_s19, %s3748_s19   ;;  %s2814_s18 = sphi %s2911_s18, %s3747_s18  }
   0x7   : > { %s2435_s23 = sadd.s32 4294967294, %s2826_s21   ;;  %s2936_s24 = sadd.s32 1, %s2826_s21  }
   0x8   : > { %3735 = sst [smem:[#allocation6_spill]] %s2936_s24  ;;  %s340_s25 = sadd.s32 1, %s2822_s20 }
   0x9   : > { %s337_s26 = ssub.s32 %s2826_s21, %s2936_s24  ;;  %p350_p0 = scmp.ne.s32.totalorder %s2822_s20, %s2818_s19 }
   0xa   : > { %p338_p1 = scmp.eq.s32.totalorder %s337_s26, 0  ;;  %p351_p2 = scmp.eq.s32.totalorder %s2932_s22, 1 }
   0xb   : > { %p356_p3 = scmp.ne.s32.totalorder %s2818_s19, %s2814_s18  ;;  %p357_p4 = scmp.eq.s32.totalorder %s2435_s23, 1 }
   0xc   : > { %s2947_s27 = scalar_select %p338_p1, %s2822_s20, %s340_s25  }
   0xd   : > { %p2949_p5 = por %p351_p2, %p350_p0  ;;  %p2953_p6 = por %p357_p4, %p356_p3 }
   0xe   : > { %3736 = sst [smem:[#allocation7_spill]] %s2947_s27  ;;  %p2438_p7 = scmp.ge.s32.totalorder %s2826_s21, 1 }
   0xf   : > { %s3738_s29 = scalar_select %p2953_p6, 1, 0 }
  0x10   : > { %p456_p8 = scmp.lt.s32.totalorder %s2826_s21, 3 }
  0x11   : > { %3739 = sst [smem:[#allocation8_spill]] %s3738_s29 }
  0x12   : > { %p457_p9 = pnand %p2438_p7, %p456_p8 }
  0x13   : > { %s2440_s30 = sshll.u32 (!%p457_p9), %s2932_s22, 1  ;;  %s3740_s1 = sld [smem:[#allocation10_spill]] (!%p457_p9) }
  0x14   : > { %460 = sbr.rel (%p457_p9) target bundleno = 2925 (0xb6d), region = 76  ;;  %p517_p10 = scmp.lt.s32.totalorder (!%p457_p9), %s2440_s30, 3 }
  0x15   : > { %s3741_s0 = sld [smem:[#allocation9_spill]] (!%p457_p9)  ;;  %s505_s27 = sand.u32 (!%p457_p9), 1, %s2818_s19  }
  0x16   : > { %s2597_s23 = sshll.u32 (!%p457_p9), %s2932_s22, 5 }
  0x19   : > { %s3750_s30 = smov (!%p517_p10, %s2440_s30), 3  ;;  %vm545_vm0 = vcmask 261120   ;;  %v2828_v24 = vmov 32.0   ;;  %v771_v29 = vld [vmem:[%s3716_s5 + $0x18] sm:$0xff]  ;;  %v770_v31 = vld [vmem:[%s3716_s5 + $0x10] sm:$0xff]  ;;  %v769_v32 = vld [vmem:[%s3716_s5 + $0x8] sm:$0xff] }
  0x1a   : > { %s2444_s16 = sshll.u32 %s3750_s30, 3  ;;  %s3730_s17 = sshll.u32 %s3750_s30, 4  ;;  %2664 = vrcp.f32 %v2828_v24  ;;  %794 = vmatpush.msra.mxu1 %v771_v29  ;;  %2598 = vmatpush.msra.mxu3 %v771_v29  ;;  %v768_v34 = vld [vmem:[%s3716_s5] sm:$0xff]  ;;  %v718_v38 = vld [vmem:[%s3715_s4 + $0x18] sm:$0xff]  ;;  %v717_v42 = vld [vmem:[%s3715_s4 + $0x10] sm:$0xff] }
  0x1b   : > { %s527_s26 = scalar_lea.vmem %s3740_s1, %s2444_s16  ;;  %s2974_s24 = scalar_lea.vmem %s3741_s0, %s3730_s17  ;;  %747 = vmatpush.msra.mxu0 %v718_v38  ;;  %v716_v44 = vld [vmem:[%s3715_s4 + $0x8] sm:$0xff]  ;;  %v715_v46 = vld [vmem:[%s3715_s4] sm:$0xff]  ;;  %v808_v50 = vld [vmem:[%s3717_s6 + $0x18] sm:$0xff] }
  0x1c   : > { %v2967_v0 = vld [vmem:[%s527_s26] sm:$0xff]  ;;  %v2981_v3 = vld [vmem:[%s2974_s24 + $0x8] sm:$0xff]  ;;  %v3003_v14 = vld [vmem:[%s2974_s24 + $0x10] sm:$0xff]  ;;  %795 = vmatpush.msra.mxu1 %v770_v31  ;;  %2599 = vmatpush.msra.mxu3 %v770_v31  ;;  %s3742_s16 = sshll.u32 %s3750_s30, 4  ;;  %s2327_s30 = scalar_lea.hbm %s3725_s14, %s2597_s23 }
  0x1d   : > { %v663_v1 = vsel %vm545_vm0, %v2967_v0, 0.0  ;;  %v671_v2 = vmul.f32 %v2967_v0, %v2967_v0  ;;  %v549_v4 = vsel %vm545_vm0, %v2981_v3, 0.0  ;;  %v2986_v5 = vld [vmem:[%s2974_s24] sm:$0xff]  ;;  %v2991_v8 = vld [vmem:[%s527_s26 + $0x8] sm:$0xff]  ;;  %v570_v12 = vmul.f32 %v2981_v3, %v2981_v3  ;;  %v3010_v18 = vld [vmem:[%s2974_s24 + $0x18] sm:$0xff]  ;;  %748 = vmatpush.msra.mxu0 %v717_v42  ;;  %2602 = vmatpush.msra.mxu2 %v808_v50  ;;  %s535_s26 = scalar_lea.vmem %s3726_s15, %s3742_s16  ;;  %s2439_s16 = sshll.u32 %s505_s27, 5 }
  0x1e   : > { %664 = vadd.xlane.f32.xlu0 %v663_v1  ;;  %550 = vadd.xlane.f32.xlu2 %v549_v4  ;;  %v569_v7 = vmul.f32 %v2986_v5, %v2986_v5  ;;  %v546_v9 = vsel %vm545_vm0, %v2986_v5, 0.0  ;;  %v666_v10 = vsel %vm545_vm0, %v2991_v8, 0.0  ;;  %v672_v13 = vmul.f32 %v2991_v8, %v2991_v8  ;;  %v807_v54 = vld [vmem:[%s3717_s6 + $0x10] sm:$0xff]  ;;  %v806_v58 = vld [vmem:[%s3717_s6 + $0x8] sm:$0xff]  ;;  %v805_v61 = vld [vmem:[%s3717_s6] sm:$0xff]  ;;  %s2330_s0 = sshll.u32 %s2327_s30, 4  ;;  %s2331_s0 = int_to_ptr.hbm [resolvable:$true] %s2330_s0 }
  0x1f   : > { %v673_v6 = vsel %vm545_vm0, %v671_v2, 0.0  ;;  %v576_v15 = vsel %vm545_vm0, %v570_v12, 0.0  ;;  %v552_v16 = vsel %vm545_vm0, %v3003_v14, 0.0  ;;  %v571_v19 = vmul.f32 %v3003_v14, %v3003_v14  ;;  %796 = vmatpush.msra.mxu1 %v769_v32  ;;  %2600 = vmatpush.msra.mxu3 %v769_v32  ;;  %v3101_v32 = vld [vmem:[%s3714_s3] ss:$0 sm:$0xff]  ;;  %s2309_s1 = scalar_lea.sflag [#allocation3], %s505_s27 }
  0x20   : > { %674 = vadd.xlane.f32.xlu1 %v673_v6  ;;  %v573_v11 = vsel %vm545_vm0, %v569_v7, 0.0  ;;  %v676_v17 = vsel %vm545_vm0, %v672_v13, 0.0  ;;  %v572_v20 = vmul.f32 %v3010_v18, %v3010_v18  ;;  %v555_v23 = vsel %vm545_vm0, %v3010_v18, 0.0  ;;  %v2665_v25 = vpop.eup %2664  ;;  %749 = vmatpush.msra.mxu0 %v716_v44  ;;  %s2778_s29 = sshra.s32 %s2331_s0, 4  ;;  %s2784_s23 = scalar_lea.hbm %s3725_s14, 64  ;;  %s2779_s29 = int_to_ptr.hbm [resolvable:$true] %s2778_s29 }
  0x21   : > { %v579_v21 = vsel %vm545_vm0, %v571_v19, 0.0  ;;  %v559_v26 = vmul.f32 32.0, %v2665_v25  ;;  %vm563_vm1 = vweird.f32 %v2665_v25  ;;  %797 = vmatpush.msra.mxu1 %v768_v34  ;;  %2601 = vmatpush.msra.mxu3 %v768_v34  ;;  %s2780_s17 = scalar_lea.hbm %s2779_s29, 32  ;;  %p2785_p0 = scmp.lt.s32.totalorder %s2779_s29, %s3725_s14 }
  0x22   : > { %v582_v22 = vsel %vm545_vm0, %v572_v20, 0.0  ;;  %750 = vmatpush.msra.mxu0 %v715_v46  ;;  %2603 = vmatpush.msra.mxu2 %v807_v54  ;;  %p2781_p11 = scmp.ne.s32.totalorder %s2779_s29, %s2780_s17  ;;  %p2786_p1 = scmp.lt.s32.totalorder %s2784_s23, %s2780_s17 }
  0x23   : > { %v560_v27 = vsub.f32 1.0, %v559_v26  ;;  %v3094_v26 = vld [vmem:[%s3713_s2] ss:$0 sm:$0xff] }
  0x24   : > { %825 = vmatpush.msrb.mxu0 %v808_v50  ;;  %2604 = vmatpush.msra.mxu2 %v806_v58  ;;  %p2782_p12 = pnand %p2781_p11, %p2949_p5  ;;  %p2787_p2 = por %p2786_p1, %p2785_p0 }
  0x25   : > { %v561_v28 = vmul.f32 %v2665_v25, %v560_v27 }
  0x26   : > { %547 = vadd.xlane.f32.xlu0 %v546_v9  ;;  %667 = vadd.xlane.f32.xlu2 %v666_v10  ;;  %p2783_p13 = pneg %p2782_p12 }
  0x27   : > { %v562_v30 = vadd.f32 %v2665_v25, %v561_v28  ;;  %826 = vmatpush.msrb.mxu0 %v807_v54  ;;  %2605 = vmatpush.msra.mxu2 %v805_v61 }
  0x28   : > { %574 = vadd.xlane.f32.xlu1 %v573_v11  ;;  %p2788_p3 = pnand %p2787_p2, %p2783_p13 }
  0x29   : > { %v3029_v33 = vsel %vm563_vm1, %v2665_v25, %v562_v30  ;;  %827 = vmatpush.msrb.mxu0 %v806_v58 }
  0x2b   : > { %828 = vmatpush.msrb.mxu0 %v805_v61 }
  0x2e   : > { %577 = vadd.xlane.f32.xlu0 %v576_v15  ;;  %553 = vadd.xlane.f32.xlu2 %v552_v16 }
  0x30   : > { %677 = vadd.xlane.f32.xlu1 %v676_v17 }
  0x36   : > { %580 = vadd.xlane.f32.xlu0 %v579_v21  ;;  %583 = vadd.xlane.f32.xlu2 %v582_v22 }
  0x38   : > { %556 = vadd.xlane.f32.xlu1 %v555_v23 }
  0x91   : > { %v665_v35 = vpop.xlane.xlu0 %664  ;;  %v551_v37 = vpop.xlane.xlu2 %550 }
  0x92   : > { %v3035_v36 = vmul.f32 %v665_v35, %v3029_v33  ;;  %v3065_v55 = vmul.f32 %v3029_v33, %v551_v37 }
  0x93   : > { %v675_v39 = vpop.xlane.xlu1 %674 }
  0x94   : > { %v681_v40 = vmul.f32 %v3035_v36, %v3035_v36  ;;  %v679_v41 = vmul.f32 %v675_v39, %v3029_v33  ;;  %v590_v1 = vmul.f32 %v3065_v55, %v3065_v55  ;;  %v685_v25 = vsub.f32 %v2967_v0, %v3035_v36 }
  0x96   : > { %v683_v43 = vsub.f32 %v679_v41, %v681_v40 }
  0x98   : > { %v687_v45 = vadd.f32 1e-05, %v683_v43 }
  0x99   : > { %v548_v47 = vpop.xlane.xlu0 %547  ;;  %v668_v49 = vpop.xlane.xlu2 %667 }
  0x9a   : > { %2666 = vrsqrt.f32 %v687_v45  ;;  %v3053_v48 = vmul.f32 %v3029_v33, %v548_v47  ;;  %v3068_v57 = vmul.f32 %v668_v49, %v3029_v33  ;;  %vm695_vm3 = vweird.f32 %v687_v45 }
  0x9b   : > { %v575_v51 = vpop.xlane.xlu1 %574 }
  0x9c   : > { %v589_v52 = vmul.f32 %v3053_v48, %v3053_v48  ;;  %v585_v53 = vmul.f32 %v575_v51, %v3029_v33  ;;  %v682_v2 = vmul.f32 %v3068_v57, %v3068_v57  ;;  %v597_v51 = vsub.f32 %v2986_v5, %v3053_v48 }
  0x9d   : > { %v598_v48 = vsub.f32 %v2981_v3, %v3065_v55  ;;  %v2478_v3 = vld [vmem:[%s3716_s5 + $0x38] sm:$0xff]  ;;  %v2477_v55 = vld [vmem:[%s3716_s5 + $0x30] sm:$0xff] }
  0x9e   : > { %v593_v56 = vsub.f32 %v585_v53, %v589_v52 }
  0xa0   : > { %v2667_v59 = vpop.eup %2666  ;;  %v601_v60 = vadd.f32 1e-05, %v593_v56 }
  0xa1   : > { %v690_v62 = vmul.f32 %v2667_v59, %v687_v45  ;;  %v578_v63 = vpop.xlane.xlu0 %577  ;;  %v554_v6 = vpop.xlane.xlu2 %553  ;;  %vm696_vm2 = vweird.f32 %v2667_v59 }
  0xa2   : > { %2668 = vrsqrt.f32 %v601_v60  ;;  %v586_v4 = vmul.f32 %v578_v63, %v3029_v33  ;;  %v3083_v12 = vmul.f32 %v3029_v33, %v554_v6  ;;  %vm697_vm4 = vmor %vm695_vm3, %vm696_vm2  ;;  %vm611_vm6 = vweird.f32 %v601_v60 }
  0xa3   : > { %v691_v7 = vmul.f32 %v2667_v59, %v690_v62  ;;  %v678_v9 = vpop.xlane.xlu1 %677 }
  0xa4   : > { %v594_v10 = vsub.f32 %v586_v4, %v590_v1  ;;  %v680_v11 = vmul.f32 %v678_v9, %v3029_v33  ;;  %v591_v21 = vmul.f32 %v3083_v12, %v3083_v12 }
  0xa5   : > { %v692_v13 = vmul.f32 0.5, %v691_v7 }
  0xa6   : > { %v602_v15 = vadd.f32 1e-05, %v594_v10  ;;  %v684_v16 = vsub.f32 %v680_v11, %v682_v2  ;;  %v686_v10 = vsub.f32 %v2991_v8, %v3068_v57  ;;  %v2476_v57 = vld [vmem:[%s3716_s5 + $0x28] sm:$0xff] }
  0xa7   : > { %v693_v17 = vsub.f32 1.5, %v692_v13 }
  0xa8   : > { %v2669_v19 = vpop.eup %2668  ;;  %2670 = vrsqrt.f32 %v602_v15  ;;  %v3085_v20 = vadd.f32 1e-05, %v684_v16  ;;  %vm621_vm9 = vweird.f32 %v602_v15 }
  0xa9   : > { %v694_v22 = vmul.f32 %v2667_v59, %v693_v17  ;;  %v606_v23 = vmul.f32 %v2669_v19, %v601_v60  ;;  %v581_v24 = vpop.xlane.xlu0 %580  ;;  %v584_v28 = vpop.xlane.xlu2 %583  ;;  %vm612_vm5 = vweird.f32 %v2669_v19 }
  0xaa   : > { %2672 = vrsqrt.f32 %v3085_v20  ;;  %v587_v27 = vmul.f32 %v581_v24, %v3029_v33  ;;  %v588_v36 = vmul.f32 %v584_v28, %v3029_v33  ;;  %vm613_vm7 = vmor %vm611_vm6, %vm612_vm5  ;;  %vm705_vm12 = vweird.f32 %v3085_v20 }
  0xab   : > { %v698_v29 = vsel %vm697_vm4, %v2667_v59, %v694_v22  ;;  %v607_v30 = vmul.f32 %v2669_v19, %v606_v23  ;;  %v557_v31 = vpop.xlane.xlu1 %556  ;;  %v2475_v22 = vld [vmem:[%s3716_s5 + $0x20] sm:$0xff]  ;;  %vm836_vm5 = vcmask 64512  }
  0xac   : > { %v709_v0 = vmul.f32 %v698_v29, %v685_v25  ;;  %v595_v34 = vsub.f32 %v587_v27, %v591_v21  ;;  %v3104_v35 = vmul.f32 %v3029_v33, %v557_v31  ;;  %v599_v27 = vsub.f32 %v3003_v14, %v3083_v12 }
  0xad   : > { %v608_v37 = vmul.f32 0.5, %v607_v30 }
  0xae   : > { %v2671_v38 = vpop.eup %2670  ;;  %v711_v39 = vmul.f32 %v3094_v26, %v709_v0  ;;  %v3108_v40 = vadd.f32 1e-05, %v595_v34  ;;  %v592_v41 = vmul.f32 %v3104_v35, %v3104_v35  ;;  %v600_v34 = vsub.f32 %v3010_v18, %v3104_v35  ;;  %v2650_v18 = vld [vmem:[%s3719_s8] ss:$0 sm:$0xff] }
  0xaf   : > { %v609_v42 = vsub.f32 1.5, %v608_v37  ;;  %v616_v43 = vmul.f32 %v2671_v38, %v602_v15  ;;  %vm622_vm8 = vweird.f32 %v2671_v38  ;;  %v2651_v35 = vld [vmem:[%s3718_s7] ss:$0 sm:$0xff] }
  0xb0   : > { %v2673_v44 = vpop.eup %2672  ;;  %v3113_v45 = vadd.f32 %v3101_v32, %v711_v39  ;;  %2674 = vrsqrt.f32 %v3108_v40  ;;  %v596_v46 = vsub.f32 %v588_v36, %v592_v41  ;;  %vm623_vm11 = vmor %vm621_vm9, %vm622_vm8  ;;  %vm631_vm15 = vweird.f32 %v3108_v40 }
  0xb1   : > { %v610_v47 = vmul.f32 %v2669_v19, %v609_v42  ;;  %v617_v49 = vmul.f32 %v2671_v38, %v616_v43  ;;  %v700_v50 = vmul.f32 %v2673_v44, %v3085_v20  ;;  %vm706_vm10 = vweird.f32 %v2673_v44 }
  0xb2   : > { %v604_v52 = vadd.f32 1e-05, %v596_v46  ;;  %2452 = vmatmul.msk.f32.vlgmr.msra.gmra.mxu1 %vm545_vm0, %v3113_v45  ;;  %vm707_vm13 = vmor %vm705_vm12, %vm706_vm10 }
  0xb3   : > { %v614_v53 = vsel %vm613_vm7, %v2669_v19, %v610_v47  ;;  %v618_v54 = vmul.f32 0.5, %v617_v49  ;;  %v701_v56 = vmul.f32 %v2673_v44, %v700_v50  ;;  %v2652_v47 = vld [vmem:[%s3720_s9] ss:$0 sm:$0xff] }
  0xb4   : > { %2676 = vrsqrt.f32 %v604_v52  ;;  %v645_v58 = vmul.f32 %v614_v53, %v597_v51  ;;  %vm641_vm2 = vweird.f32 %v604_v52 }
  0xb5   : > { %v619_v59 = vsub.f32 1.5, %v618_v54  ;;  %v702_v61 = vmul.f32 0.5, %v701_v56 }
  0xb6   : > { %v2675_v60 = vpop.eup %2674  ;;  %v652_v62 = vmul.f32 %v3094_v26, %v645_v58  ;;  %v2468_v58 = vld [vmem:[%s3715_s4 + $0x30] sm:$0xff] }
  0xb7   : > { %v620_v63 = vmul.f32 %v2671_v38, %v619_v59  ;;  %v703_v1 = vsub.f32 1.5, %v702_v61  ;;  %v626_v5 = vmul.f32 %v2675_v60, %v3108_v40  ;;  %vm632_vm14 = vweird.f32 %v2675_v60  ;;  %v2467_v61 = vld [vmem:[%s3715_s4 + $0x28] sm:$0xff] }
  0xb8   : > { %v3126_v2 = vadd.f32 %v3101_v32, %v652_v62  ;;  %vm633_vm1 = vmor %vm631_vm15, %vm632_vm14 }
  0xb9   : > { %v624_v4 = vsel %vm623_vm11, %v2671_v38, %v620_v63  ;;  %v704_v6 = vmul.f32 %v2673_v44, %v703_v1  ;;  %v627_v7 = vmul.f32 %v2675_v60, %v626_v5 }
  0xba   : > { %v2677_v9 = vpop.eup %2676  ;;  %2448 = vmatmul.msk.f32.vlgmr.msra.gmra.mxu0 %vm545_vm0, %v3126_v2  ;;  %v646_v11 = vmul.f32 %v624_v4, %v598_v48  ;;  %v2653_v4 = vld [vmem:[%s3719_s8 + $0x1] ss:$0 sm:$0xff] }
  0xbb   : > { %v708_v13 = vsel %vm707_vm13, %v2673_v44, %v704_v6  ;;  %v628_v15 = vmul.f32 0.5, %v627_v7  ;;  %v636_v16 = vmul.f32 %v2677_v9, %v604_v52  ;;  %1073 = vmatpush.msra.mxu0 %v2478_v3  ;;  %vm642_vm3 = vweird.f32 %v2677_v9  ;;  %v2469_v52 = vld [vmem:[%s3715_s4 + $0x38] sm:$0xff] }
  0xbc   : > { %v710_v17 = vmul.f32 %v708_v13, %v686_v10  ;;  %v653_v8 = vmul.f32 %v3094_v26, %v646_v11  ;;  %vm643_vm4 = vmor %vm641_vm2, %vm642_vm3 }
  0xbd   : > { %v629_v19 = vsub.f32 1.5, %v628_v15  ;;  %v637_v20 = vmul.f32 %v2677_v9, %v636_v16  ;;  %1074 = vmatpush.msra.mxu0 %v2477_v55 }
  0xbe   : > { %v712_v21 = vmul.f32 %v3094_v26, %v710_v17  ;;  %v3154_v28 = vadd.f32 %v3101_v32, %v653_v8  ;;  %v2654_v17 = vld [vmem:[%s3718_s7 + $0x1] ss:$0 sm:$0xff] }
  0xbf   : > { %v630_v23 = vmul.f32 %v2675_v60, %v629_v19  ;;  %v638_v24 = vmul.f32 0.5, %v637_v20  ;;  %1075 = vmatpush.msra.mxu0 %v2476_v57 }
  0xc0   : > { %v3149_v25 = vadd.f32 %v3101_v32, %v712_v21 }
  0xc1   : > { %v634_v29 = vsel %vm633_vm1, %v2675_v60, %v630_v23  ;;  %v639_v30 = vsub.f32 1.5, %v638_v24  ;;  %1076 = vmatpush.msra.mxu0 %v2475_v22  ;;  %v2466_v60 = vld [vmem:[%s3715_s4 + $0x20] sm:$0xff] }
  0xc2   : > { %2449 = vmatmul.msk.f32.gmra.mxu0 %vm545_vm0, %v3154_v28  ;;  %2453 = vmatmul.msk.f32.vlgmr.msra.gmra.mxu3 %vm545_vm0, %v3149_v25  ;;  %v647_v31 = vmul.f32 %v634_v29, %v599_v27 }
  0xc3   : > { %v640_v0 = vmul.f32 %v2677_v9, %v639_v30  ;;  %2455 = vmatmul.msk.f32.vlgmr.msra.gmra.mxu2 %vm545_vm0, %v3149_v25 }
  0xc4   : > { %v654_v14 = vmul.f32 %v3094_v26, %v647_v31 }
  0xc5   : > { %v644_v12 = vsel %vm643_vm4, %v2677_v9, %v640_v0 }
  0xc6   : > { %v3166_v36 = vadd.f32 %v3101_v32, %v654_v14  ;;  %v648_v37 = vmul.f32 %v644_v12, %v600_v34 }
  0xc8   : > { %v655_v38 = vmul.f32 %v3094_v26, %v648_v37 }
  0xca   : > { %2450 = vmatmul.msk.f32.gmra.mxu0 %vm545_vm0, %v3166_v36  ;;  %v3172_v39 = vadd.f32 %v3101_v32, %v655_v38 }
  0xd2   : > { %2451 = vmatmul.msk.f32.gmra.mxu0 %vm545_vm0, %v3172_v39 }
  0xda   : > { %2454 = vmatmul.msk.f32.vlgmr.msrb.gmra.mxu0 %vm545_vm0, %v3113_v45 }
  0xe2   : > { %2480 = vmatmul.msk.f32.vlgmr.msra.gmra.mxu0 %vm545_vm0, %v3113_v45 }
  0xea   : > { %2481 = vmatmul.msk.f32.gmra.mxu0 %vm545_vm0, %v3149_v25 }
 0x12f   : > { %v799_v26 = vpop.f32.mrf.mxu1 }
 0x130   : > { %v800_v32 = vadd.f32 %v2650_v18, %v799_v26 }
 0x132   : > { %2456 = vmatpush.xpose.msk.msrb.mxu3 %vm836_vm5, %v800_v32 }
 0x137   : > { %v752_v40 = vpop.f32.mrf.mxu0 }
 0x138   : > { %v753_v41 = vadd.f32 %v2651_v35, %v752_v40 }
 0x13a   : > { %v764_v42 = vmul.f32 0.35355338, %v753_v41 }
 0x13c   : > { %2457 = vmatmul.msk.f32.vlgmr.msrb.gmra.mxu3 %vm836_vm5, %v764_v42 }
 0x13f   : > { %v755_v43 = vpop.f32.mrf.mxu0 }
 0x140   : > { %v756_v44 = vadd.f32 %v2651_v35, %v755_v43 }
 0x142   : > { %v765_v46 = vmul.f32 0.35355338, %v756_v44 }
 0x144   : > { %2458 = vmatmul.msk.f32.gmra.mxu3 %vm836_vm5, %v765_v46 }
 0x145   : > { %v802_v49 = vpop.f32.mrf.mxu3 }
 0x146   : > { %v803_v50 = vadd.f32 %v2650_v18, %v802_v49  ;;  %v833_v51 = vpop.f32.mrf.mxu2 }
 0x147   : > { %v834_v53 = vadd.f32 %v2652_v47, %v833_v51  ;;  %v758_v54 = vpop.f32.mrf.mxu0 }
 0x148   : > { %v759_v56 = vadd.f32 %v2651_v35, %v758_v54  ;;  %2459 = vmatpush.xpose.msk.msra.mxu3 %vm836_vm5, %v803_v50 }
 0x149   : > { %999 = vmatpush.msrb.mxu2 %v834_v53 }
 0x14a   : > { %v766_v59 = vmul.f32 0.35355338, %v759_v56 }
 0x14c   : > { %1030 = vmatpush.msrb.mxu3 %v2469_v52 }
 0x14d   : > { %2460 = vmatmul.msk.f32.vlgmr.msra.gmra.mxu3 %vm836_vm5, %v766_v59 }
 0x14e   : > { %1031 = vmatpush.msrb.mxu3 %v2468_v58 }
 0x14f   : > { %v761_v62 = vpop.f32.mrf.mxu0 }
 0x150   : > { %1032 = vmatpush.msrb.mxu3 %v2467_v61  ;;  %v762_v63 = vadd.f32 %v2651_v35, %v761_v62 }
 0x152   : > { %1033 = vmatpush.msrb.mxu3 %v2466_v60  ;;  %v767_v1 = vmul.f32 0.35355338, %v762_v63 }
 0x155   : > { %2461 = vmatmul.msk.f32.gmra.mxu3 %vm836_vm5, %v767_v1 }
 0x157   : > { %v830_v5 = vpop.f32.mrf.mxu0 }
 0x158   : > { %v831_v48 = vadd.f32 %v2652_v47, %v830_v5 }
 0x15a   : > { %970 = vmatpush.msrb.mxu1 %v831_v48 }
 0x15d   : > { %2471 = vmatmul.msk.f32.vlgmr.msrb.gmra.mxu3 %vm545_vm0, %v3126_v2 }
 0x15f   : > { %v1078_v6 = vpop.f32.mrf.mxu0 }
 0x160   : > { %v1079_v7 = vadd.f32 %v2653_v4, %v1078_v6  ;;  %v2484_v6 = vld [vmem:[%s3717_s6 + $0x30] sm:$0xff] }
 0x162   : > { %2489 = vmatpush.xpose.msk.msra.mxu2 %vm836_vm5, %v1079_v7  ;;  %v2483_v7 = vld [vmem:[%s3717_s6 + $0x28] sm:$0xff] }
 0x165   : > { %2472 = vmatmul.msk.f32.gmra.mxu3 %vm545_vm0, %v3154_v28 }
 0x167   : > { %v1081_v9 = vpop.f32.mrf.mxu0 }
 0x168   : > { %v1082_v10 = vadd.f32 %v2653_v4, %v1081_v9  ;;  %v2485_v4 = vld [vmem:[%s3717_s6 + $0x38] sm:$0xff]  ;;  %v1007_v9 = vld [vmem:[%s3721_s10] sm:$0xff] }
 0x169   : > { %1106 = vmatpush.msra.mxu1 %v2485_v4 }
 0x16a   : > { %2492 = vmatpush.xpose.msk.msrb.mxu0 %vm836_vm5, %v1082_v10  ;;  %v2482_v10 = vld [vmem:[%s3717_s6 + $0x20] sm:$0xff] }
 0x16b   : > { %1107 = vmatpush.msra.mxu1 %v2484_v6  ;;  %v2527_v6 = vld [vmem:[%s3717_s6 + $0x58] sm:$0xff] }
 0x16d   : > { %2473 = vmatmul.msk.f32.gmra.mxu3 %vm545_vm0, %v3166_v36  ;;  %1108 = vmatpush.msra.mxu1 %v2483_v7  ;;  %v2526_v7 = vld [vmem:[%s3717_s6 + $0x50] sm:$0xff] }
 0x16e   : > { %1357 = vmatpush.msra.mxu0 %v1007_v9  ;;  %v2525_v9 = vld [vmem:[%s3717_s6 + $0x48] sm:$0xff] }
 0x16f   : > { %1109 = vmatpush.msra.mxu1 %v2482_v10 }
 0x175   : > { %2474 = vmatmul.msk.f32.gmra.mxu3 %vm545_vm0, %v3172_v39 }
 0x1bf   : > { %v863_v11 = vpop.f32.mrf.mxu3 }
 0x1c0   : > { %v901_v19 = vsel %vm836_vm5, %v863_v11, -inf }
 0x1c7   : > { %v866_v3 = vpop.f32.mrf.mxu3 }
 0x1c8   : > { %v904_v41 = vsel %vm836_vm5, %v866_v3, -inf }
 0x1d0   : > { %v895_v55 = vpop.f32.mrf.mxu3 }
 0x1d1   : > { %v907_v13 = vsel %vm836_vm5, %v895_v55, -inf }
 0x1d2   : > { %908 = vmax.xlane.f32.xlu0 %v907_v13 }
 0x1d8   : > { %v898_v15 = vpop.f32.mrf.mxu3 }
 0x1d9   : > { %v910_v16 = vsel %vm836_vm5, %v898_v15, -inf }
 0x1da   : > { %911 = vmax.xlane.f32.xlu1 %v910_v16 }
 0x1e0   : > { %v1035_v8 = vpop.f32.mrf.mxu3 }
 0x1e1   : > { %v1036_v57 = vadd.f32 %v2654_v17, %v1035_v8 }
 0x1e2   : > { %902 = vmax.xlane.f32.xlu1 %v901_v19 }
 0x1e3   : > { %v1047_v1 = vmul.f32 0.35355338, %v1036_v57 }
 0x1e8   : > { %v1038_v20 = vpop.f32.mrf.mxu3 }
 0x1e9   : > { %v1039_v21 = vadd.f32 %v2654_v17, %v1038_v20 }
 0x1eb   : > { %v1048_v48 = vmul.f32 0.35355338, %v1039_v21 }
 0x1f0   : > { %v1041_v22 = vpop.f32.mrf.mxu3 }
 0x1f1   : > { %v1042_v23 = vadd.f32 %v2654_v17, %v1041_v22 }
 0x1f3   : > { %v1049_v24 = vmul.f32 0.35355338, %v1042_v23 }
 0x1f5   : > { %2493 = vmatmul.msk.f32.vlgmr.msrb.gmra.mxu0 %vm836_vm5, %v1049_v24 }
 0x1f8   : > { %v1044_v27 = vpop.f32.mrf.mxu3 }
 0x1f9   : > { %v1045_v29 = vadd.f32 %v2654_v17, %v1044_v27 }
 0x1fb   : > { %v1050_v30 = vmul.f32 0.35355338, %v1045_v29 }
 0x1fd   : > { %2494 = vmatmul.msk.f32.gmra.mxu0 %vm836_vm5, %v1050_v30 }
 0x245   : > { %v909_v31 = vpop.xlane.xlu0 %908 }
 0x246   : > { %v915_v0 = vsub.f32 %v895_v55, %v909_v31 }
 0x248   : > { %v921_v14 = vmul.f32 1.442695, %v915_v0 }
 0x24a   : > { %2678 = vpow2.f32 %v921_v14  ;;  %v2655_v14 = vld [vmem:[%s3720_s9 + $0x1] ss:$0 sm:$0xff] }
 0x24d   : > { %v912_v12 = vpop.xlane.xlu1 %911 }
 0x24e   : > { %v916_v34 = vsub.f32 %v898_v15, %v912_v12 }
 0x250   : > { %v2679_v37 = vpop.eup %2678  ;;  %v923_v38 = vmul.f32 1.442695, %v916_v34 }
 0x251   : > { %v931_v18 = vsel %vm836_vm5, %v2679_v37, 0.0 }
 0x252   : > { %2680 = vpow2.f32 %v923_v38  ;;  %932 = vadd.xlane.f32.xlu2 %v931_v18 }
 0x255   : > { %v903_v26 = vpop.xlane.xlu1 %902 }
 0x256   : > { %v913_v32 = vsub.f32 %v863_v11, %v903_v26 }
 0x258   : > { %v2681_v35 = vpop.eup %2680  ;;  %v917_v40 = vmul.f32 1.442695, %v913_v32 }
 0x259   : > { %v934_v42 = vsel %vm836_vm5, %v2681_v35, 0.0 }
 0x25a   : > { %2682 = vpow2.f32 %v917_v40  ;;  %905 = vmax.xlane.f32.xlu2 %v904_v41  ;;  %935 = vadd.xlane.f32.xlu0 %v934_v42 }
 0x260   : > { %v2683_v43 = vpop.eup %2682 }
 0x261   : > { %v925_v44 = vsel %vm836_vm5, %v2683_v43, 0.0 }
 0x262   : > { %926 = vadd.xlane.f32.xlu0 %v925_v44 }
 0x272   : > { %v1175_v46 = vpop.f32.mrf.mxu0 }
 0x273   : > { %v1187_v47 = vsel %vm836_vm5, %v1175_v46, -inf }
 0x274   : > { %1188 = vmax.xlane.f32.xlu0 %v1187_v47 }
 0x27a   : > { %v1178_v21 = vpop.f32.mrf.mxu0 }
 0x27b   : > { %v1190_v23 = vsel %vm836_vm5, %v1178_v21, -inf }
 0x2c5   : > { %v933_v49 = vpop.xlane.xlu2 %932 }
 0x2c6   : > { %2684 = vrcp.f32 %v933_v49 }
 0x2cc   : > { %v2685_v50 = vpop.eup %2684 }
 0x2cd   : > { %v906_v51 = vpop.xlane.xlu2 %905  ;;  %v936_v52 = vpop.xlane.xlu0 %935  ;;  %v3235_v53 = vmul.f32 %v2685_v50, %v2679_v37 }
 0x2ce   : > { %v914_v54 = vsub.f32 %v866_v3, %v906_v51  ;;  %2686 = vrcp.f32 %v936_v52 }
 0x2cf   : > { %2464 = vmatmul.msk.f32.vlgmr.msrb.gmra.mxu2 %vm836_vm5, %v3235_v53 }
 0x2d0   : > { %v919_v56 = vmul.f32 1.442695, %v914_v54 }
 0x2d2   : > { %2688 = vpow2.f32 %v919_v56  ;;  %v2511_v56 = vld [vmem:[%s3715_s4 + $0x58] sm:$0xff] }
 0x2d4   : > { %v2687_v58 = vpop.eup %2686 }
 0x2d5   : > { %v927_v59 = vpop.xlane.xlu0 %926  ;;  %v3239_v61 = vmul.f32 %v2687_v58, %v2681_v35  ;;  %v2520_v58 = vld [vmem:[%s3716_s5 + $0x58] sm:$0xff] }
 0x2d6   : > { %2690 = vrcp.f32 %v927_v59  ;;  %v2510_v59 = vld [vmem:[%s3715_s4 + $0x50] sm:$0xff] }
 0x2d7   : > { %2465 = vmatmul.msk.f32.gmra.mxu2 %vm836_vm5, %v3239_v61 }
 0x2d8   : > { %v2689_v60 = vpop.eup %2688 }
 0x2d9   : > { %v928_v62 = vsel %vm836_vm5, %v2689_v60, 0.0 }
 0x2da   : > { %929 = vadd.xlane.f32.xlu1 %v928_v62  ;;  %v2509_v62 = vld [vmem:[%s3715_s4 + $0x48] sm:$0xff] }
 0x2dc   : > { %v2691_v63 = vpop.eup %2690 }
 0x2dd   : > { %v3244_v5 = vmul.f32 %v2691_v63, %v2683_v43  ;;  %v2518_v63 = vld [vmem:[%s3716_s5 + $0x48] sm:$0xff] }
 0x2df   : > { %2462 = vmatmul.msk.f32.vlgmr.msrb.gmra.mxu1 %vm836_vm5, %v3244_v5  ;;  %2490 = vmatmul.msk.f32.vlgmr.msra.gmra.mxu2 %vm836_vm5, %v1047_v1  ;;  %v2508_v1 = vld [vmem:[%s3715_s4 + $0x40] sm:$0xff] }
 0x2e7   : > { %2491 = vmatmul.msk.f32.gmra.mxu2 %vm836_vm5, %v1048_v48  ;;  %v1189_v17 = vpop.xlane.xlu0 %1188  ;;  %v2517_v48 = vld [vmem:[%s3716_s5 + $0x40] sm:$0xff] }
 0x2e8   : > { %v1195_v8 = vsub.f32 %v1175_v46, %v1189_v17 }
 0x2ea   : > { %v1201_v20 = vmul.f32 1.442695, %v1195_v8 }
 0x34d   : > { %v930_v11 = vpop.xlane.xlu1 %929 }
 0x34e   : > { %2692 = vrcp.f32 %v930_v11  ;;  %v2524_v11 = vld [vmem:[%s3717_s6 + $0x40] sm:$0xff] }
 0x34f   : > { %2694 = vpow2.f32 %v1201_v20 }
 0x352   : > { %v1001_v3 = vpop.f32.mrf.mxu2 }
 0x354   : > { %v2693_v55 = vpop.eup %2692 }
 0x355   : > { %v3265_v13 = vmul.f32 %v2693_v55, %v2689_v60  ;;  %v2695_v27 = vpop.eup %2694  ;;  %v2519_v60 = vld [vmem:[%s3716_s5 + $0x50] sm:$0xff] }
 0x356   : > { %v1211_v29 = vsel %vm836_vm5, %v2695_v27, 0.0 }
 0x357   : > { %2463 = vmatmul.msk.f32.gmra.mxu1 %vm836_vm5, %v3265_v13 }
 0x35a   : > { %v1004_v15 = vpop.f32.mrf.mxu2 }
 0x35c   : > { %v972_v16 = vpop.f32.mrf.mxu1 }
 0x35d   : > { %2504 = vmatmul.msk.f32.vlgmr.msra.gmra.mxu0 %vm836_vm5, %v972_v16 }
 0x35f   : > { %2487 = vmatmul.msk.f32.vlgmr.msra.gmra.mxu1 %vm545_vm0, %v3113_v45 }
 0x362   : > { %v1143_v57 = vpop.f32.mrf.mxu2 }
 0x363   : > { %v1181_v19 = vsel %vm836_vm5, %v1143_v57, -inf }
 0x364   : > { %1182 = vmax.xlane.f32.xlu2 %v1181_v19  ;;  %v2499_v19 = vld [vmem:[%s3721_s10 + $0x8] sm:$0xff] }
 0x365   : > { %1316 = vmatpush.msra.mxu3 %v2499_v19 }
 0x367   : > { %2488 = vmatmul.msk.f32.gmra.mxu1 %vm545_vm0, %v3149_v25 }
 0x36a   : > { %v1146_v22 = vpop.f32.mrf.mxu2 }
 0x36b   : > { %v1184_v24 = vsel %vm836_vm5, %v1146_v22, -inf }
 0x36c   : > { %1191 = vmax.xlane.f32.xlu2 %v1190_v23  ;;  %1185 = vmax.xlane.f32.xlu1 %v1184_v24 }
 0x374   : > { %1212 = vadd.xlane.f32.xlu1 %v1211_v29 }
 0x3d4   : > { %v975_v30 = vpop.f32.mrf.mxu1 }
 0x3d5   : > { %2505 = vmatmul.msk.f32.gmra.mxu0 %vm836_vm5, %v975_v30 }
 0x3d7   : > { %v1183_v31 = vpop.xlane.xlu2 %1182 }
 0x3d8   : > { %v1193_v0 = vsub.f32 %v1143_v57, %v1183_v31  ;;  %v2656_v31 = vld [vmem:[%s3718_s7 + $0x2] ss:$0 sm:$0xff] }
 0x3da   : > { %v1197_v12 = vmul.f32 1.442695, %v1193_v0 }
 0x3dc   : > { %2696 = vpow2.f32 %v1197_v12  ;;  %v1111_v34 = vpop.f32.mrf.mxu1 }
 0x3dd   : > { %v1112_v37 = vadd.f32 %v2655_v14, %v1111_v34  ;;  %2506 = vmatmul.msk.f32.gmra.mxu0 %vm836_vm5, %v1001_v3 }
 0x3df   : > { %v1192_v38 = vpop.xlane.xlu2 %1191  ;;  %1250 = vmatpush.msrb.mxu1 %v1112_v37  ;;  %v1186_v18 = vpop.xlane.xlu1 %1185  ;;  %v2549_v37 = vld [vmem:[%s3715_s4 + $0x78] sm:$0xff] }
 0x3e0   : > { %v1196_v26 = vsub.f32 %v1178_v21, %v1192_v38  ;;  %v1194_v32 = vsub.f32 %v1146_v22, %v1186_v18 }
 0x3e1   : > { %1393 = vmatpush.msra.mxu1 %v2511_v56 }
 0x3e2   : > { %v2697_v35 = vpop.eup %2696  ;;  %v1203_v40 = vmul.f32 1.442695, %v1196_v26  ;;  %v1199_v41 = vmul.f32 1.442695, %v1194_v32  ;;  %v2548_v26 = vld [vmem:[%s3715_s4 + $0x70] sm:$0xff] }
 0x3e3   : > { %v1205_v42 = vsel %vm836_vm5, %v2697_v35, 0.0  ;;  %1394 = vmatpush.msra.mxu1 %v2510_v59 }
 0x3e4   : > { %2698 = vpow2.f32 %v1203_v40  ;;  %1206 = vadd.xlane.f32.xlu0 %v1205_v42  ;;  %v1114_v43 = vpop.f32.mrf.mxu1  ;;  %v2547_v42 = vld [vmem:[%s3715_s4 + $0x68] sm:$0xff] }
 0x3e5   : > { %2700 = vpow2.f32 %v1199_v41  ;;  %v1115_v44 = vadd.f32 %v2655_v14, %v1114_v43  ;;  %2507 = vmatmul.msk.f32.gmra.mxu0 %vm836_vm5, %v1004_v15  ;;  %1395 = vmatpush.msra.mxu1 %v2509_v62 }
 0x3e7   : > { %1279 = vmatpush.msrb.mxu2 %v1115_v44  ;;  %v1213_v46 = vpop.xlane.xlu1 %1212  ;;  %1396 = vmatpush.msra.mxu1 %v2508_v1  ;;  %v2546_v44 = vld [vmem:[%s3715_s4 + $0x60] sm:$0xff] }
 0x3e8   : > { %2702 = vrcp.f32 %v1213_v46 }
 0x3e9   : > { %1436 = vmatpush.msra.mxu2 %v2520_v58  ;;  %v3397_v58 = vpop.f32.mrf.mxu0 }
 0x3ea   : > { %v2699_v47 = vpop.eup %2698 }
 0x3eb   : > { %v2701_v49 = vpop.eup %2700  ;;  %v1214_v50 = vsel %vm836_vm5, %v2699_v47, 0.0  ;;  %1437 = vmatpush.msra.mxu2 %v2519_v60 }
 0x3ec   : > { %1215 = vadd.xlane.f32.xlu0 %v1214_v50  ;;  %v1208_v51 = vsel %vm836_vm5, %v2701_v49, 0.0 }
 0x3ed   : > { %1209 = vadd.xlane.f32.xlu2 %v1208_v51  ;;  %1438 = vmatpush.msra.mxu2 %v2518_v63 }
 0x3ee   : > { %v2703_v52 = vpop.eup %2702 }
 0x3ef   : > { %v3287_v54 = vmul.f32 %v2703_v52, %v2695_v27  ;;  %1439 = vmatpush.msra.mxu2 %v2517_v48  ;;  %v2657_v27 = vld [vmem:[%s3719_s8 + $0x2] ss:$0 sm:$0xff] }
 0x3f1   : > { %2497 = vmatmul.msk.f32.vlgmr.msrb.gmra.mxu2 %vm836_vm5, %v3287_v54 }
 0x3f2   : > { %1469 = vmatpush.msrb.mxu2 %v2527_v6 }
 0x3f4   : > { %1470 = vmatpush.msrb.mxu2 %v2526_v7 }
 0x3f6   : > { %1471 = vmatpush.msrb.mxu2 %v2525_v9 }
 0x3f8   : > { %1472 = vmatpush.msrb.mxu2 %v2524_v11 }
 0x452   : > { %v3401_v60 = vpop.f32.mrf.mxu0 }
 0x457   : > { %v1207_v4 = vpop.xlane.xlu0 %1206 }
 0x458   : > { %2704 = vrcp.f32 %v1207_v4 }
 0x45a   : > { %v3405_v63 = vpop.f32.mrf.mxu0 }
 0x45e   : > { %v2705_v10 = vpop.eup %2704 }
 0x45f   : > { %v3327_v3 = vmul.f32 %v2705_v10, %v2697_v35  ;;  %v1216_v55 = vpop.xlane.xlu0 %1215  ;;  %v2658_v35 = vld [vmem:[%s3720_s9 + $0x2] ss:$0 sm:$0xff] }
 0x460   : > { %2706 = vrcp.f32 %v1216_v55  ;;  %v1210_v15 = vpop.xlane.xlu2 %1209 }
 0x461   : > { %2708 = vrcp.f32 %v1210_v15  ;;  %2495 = vmatmul.msk.f32.vlgmr.msrb.gmra.mxu1 %vm836_vm5, %v3327_v3 }
 0x462   : > { %v1368_v1 = vpop.f32.mrf.mxu0 }
 0x466   : > { %v2707_v16 = vpop.eup %2706 }
 0x467   : > { %v2709_v17 = vpop.eup %2708  ;;  %v3331_v8 = vmul.f32 %v2707_v16, %v2699_v47 }
 0x468   : > { %v3333_v57 = vmul.f32 %v2709_v17, %v2701_v49 }
 0x469   : > { %2498 = vmatmul.msk.f32.gmra.mxu2 %vm836_vm5, %v3331_v8 }
 0x46a   : > { %2496 = vmatmul.msk.f32.gmra.mxu1 %vm836_vm5, %v3333_v57 }
 0x471   : > { %2522 = vmatmul.msk.f32.vlgmr.msra.gmra.mxu2 %vm545_vm0, %v3113_v45 }
 0x472   : > { %2513 = vmatmul.msk.f32.vlgmr.msra.gmra.mxu1 %vm545_vm0, %v3126_v2 }
 0x474   : > { %v1281_v21 = vpop.f32.mrf.mxu2 }
 0x479   : > { %2523 = vmatmul.msk.f32.gmra.mxu2 %vm545_vm0, %v3149_v25 }
 0x47a   : > { %2514 = vmatmul.msk.f32.gmra.mxu1 %vm545_vm0, %v3154_v28 }
 0x481   : > { %2529 = vmatmul.msk.f32.vlgmr.msrb.gmra.mxu2 %vm545_vm0, %v3113_v45 }
 0x482   : > { %2515 = vmatmul.msk.f32.gmra.mxu1 %vm545_vm0, %v3166_v36 }
 0x489   : > { %2530 = vmatmul.msk.f32.gmra.mxu2 %vm545_vm0, %v3149_v25 }
 0x48a   : > { %2516 = vmatmul.msk.f32.gmra.mxu1 %vm545_vm0, %v3172_v39 }
 0x4de   : > { %v1252_v20 = vpop.f32.mrf.mxu1 }
 0x4df   : > { %2500 = vmatmul.msk.f32.vlgmr.msra.gmra.mxu3 %vm836_vm5, %v1252_v20 }
 0x4e7   : > { %v1255_v22 = vpop.f32.mrf.mxu1 }
 0x4e8   : > { %2501 = vmatmul.msk.f32.gmra.mxu3 %vm836_vm5, %v1255_v22 }
 0x4ec   : > { %v1284_v23 = vpop.f32.mrf.mxu2 }
 0x4ef   : > { %v1398_v24 = vpop.f32.mrf.mxu1 }
 0x4f0   : > { %2502 = vmatmul.msk.f32.gmra.mxu3 %vm836_vm5, %v1281_v21  ;;  %v1399_v14 = vadd.f32 %v2656_v31, %v1398_v24 }
 0x4f2   : > { %v1410_v38 = vmul.f32 0.35355338, %v1399_v14  ;;  %v2558_v14 = vld [vmem:[%s3716_s5 + $0x78] sm:$0xff] }
 0x4f4   : > { %v1441_v29 = vpop.f32.mrf.mxu2 }
 0x4f5   : > { %v1442_v30 = vadd.f32 %v2657_v27, %v1441_v29 }
 0x4f7   : > { %v1401_v0 = vpop.f32.mrf.mxu1  ;;  %2531 = vmatpush.xpose.msk.msrb.mxu3 %vm836_vm5, %v1442_v30 }
 0x4f8   : > { %2503 = vmatmul.msk.f32.gmra.mxu3 %vm836_vm5, %v1284_v23  ;;  %v1402_v40 = vadd.f32 %v2656_v31, %v1401_v0 }
 0x4fa   : > { %v1411_v47 = vmul.f32 0.35355338, %v1402_v40 }
 0x4fc   : > { %v1444_v12 = vpop.f32.mrf.mxu2 }
 0x4fd   : > { %v1445_v34 = vadd.f32 %v2657_v27, %v1444_v12  ;;  %v2557_v12 = vld [vmem:[%s3716_s5 + $0x70] sm:$0xff] }
 0x4ff   : > { %v1404_v18 = vpop.f32.mrf.mxu1  ;;  %2534 = vmatpush.xpose.msk.msrb.mxu0 %vm836_vm5, %v1445_v34  ;;  %v2556_v34 = vld [vmem:[%s3716_s5 + $0x68] sm:$0xff] }
 0x500   : > { %v1405_v32 = vadd.f32 %v2656_v31, %v1404_v18  ;;  %2532 = vmatmul.msk.f32.vlgmr.msrb.gmra.mxu3 %vm836_vm5, %v1410_v38 }
 0x502   : > { %v1412_v41 = vmul.f32 0.35355338, %v1405_v32 }
 0x503   : > { %1719 = vmatpush.msra.mxu0 %v2549_v37  ;;  %v2555_v37 = vld [vmem:[%s3716_s5 + $0x60] sm:$0xff] }
 0x504   : > { %2535 = vmatmul.msk.f32.vlgmr.msrb.gmra.mxu0 %vm836_vm5, %v1412_v41  ;;  %v1474_v43 = vpop.f32.mrf.mxu2 }
 0x505   : > { %1720 = vmatpush.msra.mxu0 %v2548_v26  ;;  %v1475_v46 = vadd.f32 %v2658_v35, %v1474_v43  ;;  %v1225_v26 = vadd.f32 %v3327_v3, %v3244_v5 }
 0x507   : > { %1721 = vmatpush.msra.mxu0 %v2547_v42  ;;  %v1407_v49 = vpop.f32.mrf.mxu1  ;;  %1613 = vmatpush.msrb.mxu1 %v1475_v46  ;;  %v1226_v46 = vadd.f32 %v3333_v57, %v3265_v13  ;;  %v2541_v13 = vld [vmem:[%s3721_s10 + $0x10] sm:$0xff]  ;;  %v2563_v57 = vld [vmem:[%s3717_s6 + $0x68] sm:$0xff] }
 0x508   : > { %v1408_v50 = vadd.f32 %v2656_v31, %v1407_v49  ;;  %2533 = vmatmul.msk.f32.gmra.mxu3 %vm836_vm5, %v1411_v47 }
 0x509   : > { %1722 = vmatpush.msra.mxu0 %v2546_v44  ;;  %1762 = vmatpush.msra.mxu1 %v2558_v14 }
 0x50a   : > { %v1413_v51 = vmul.f32 0.35355338, %v1408_v50  ;;  %1679 = vmatpush.msra.mxu3 %v2541_v13 }
 0x50b   : > { %1763 = vmatpush.msra.mxu1 %v2557_v12 }
 0x50c   : > { %2536 = vmatmul.msk.f32.gmra.mxu0 %vm836_vm5, %v1413_v51  ;;  %v1477_v52 = vpop.f32.mrf.mxu2 }
 0x50d   : > { %v1478_v56 = vadd.f32 %v2658_v35, %v1477_v52  ;;  %1764 = vmatpush.msra.mxu1 %v2556_v34  ;;  %v1227_v52 = vadd.f32 %v3287_v54, %v3235_v53  ;;  %v2565_v53 = vld [vmem:[%s3717_s6 + $0x78] sm:$0xff]  ;;  %v2564_v54 = vld [vmem:[%s3717_s6 + $0x70] sm:$0xff] }
 0x50f   : > { %1642 = vmatpush.msra.mxu2 %v1478_v56  ;;  %1765 = vmatpush.msra.mxu1 %v2555_v37 }
 0x511   : > { %1795 = vmatpush.msrb.mxu2 %v2565_v53 }
 0x513   : > { %1796 = vmatpush.msrb.mxu2 %v2564_v54 }
 0x514   : > { %2551 = vmatmul.msk.f32.vlgmr.msra.gmra.mxu0 %vm545_vm0, %v3126_v2 }
 0x515   : > { %1797 = vmatpush.msrb.mxu2 %v2563_v57 }
 0x51c   : > { %2552 = vmatmul.msk.f32.gmra.mxu0 %vm545_vm0, %v3154_v28 }
 0x524   : > { %2553 = vmatmul.msk.f32.gmra.mxu0 %vm545_vm0, %v3166_v36 }
 0x52c   : > { %2554 = vmatmul.msk.f32.gmra.mxu0 %vm545_vm0, %v3172_v39 }
 0x562   : > { %v3399_v59 = vpop.f32.mrf.mxu3 }
 0x563   : > { %v1360_v14 = vadd.f32 %v3397_v58, %v3399_v59 }
 0x56b   : > { %v3403_v62 = vpop.f32.mrf.mxu3 }
 0x573   : > { %v3407_v2 = vpop.f32.mrf.mxu3 }
 0x57b   : > { %v1327_v28 = vpop.f32.mrf.mxu3 }
 0x57c   : > { %v3409_v48 = vadd.f32 %v1368_v1, %v1327_v28  ;;  %v2562_v28 = vld [vmem:[%s3717_s6 + $0x60] sm:$0xff] }
 0x57d   : > { %1798 = vmatpush.msrb.mxu2 %v2562_v28 }
 0x581   : > { %v1538_v7 = vpop.f32.mrf.mxu0 }
 0x582   : > { %v1550_v9 = vsel %vm836_vm5, %v1538_v7, -inf }
 0x583   : > { %v1506_v36 = vpop.f32.mrf.mxu3 }
 0x584   : > { %v1544_v4 = vsel %vm836_vm5, %v1506_v36, -inf }
 0x585   : > { %1545 = vmax.xlane.f32.xlu1 %v1544_v4 }
 0x589   : > { %v1541_v22 = vpop.f32.mrf.mxu0 }
 0x58a   : > { %v1553_v29 = vsel %vm836_vm5, %v1541_v22, -inf }
 0x58b   : > { %v1509_v39 = vpop.f32.mrf.mxu3 }
 0x58c   : > { %v1547_v6 = vsel %vm836_vm5, %v1509_v39, -inf }
 0x58d   : > { %1548 = vmax.xlane.f32.xlu2 %v1547_v6 }
 0x595   : > { %1551 = vmax.xlane.f32.xlu2 %v1550_v9  ;;  %v1228_v9 = vadd.f32 %v3331_v8, %v3239_v61 }
 0x5f8   : > { %v1546_v10 = vpop.xlane.xlu1 %1545 }
 0x5f9   : > { %v1556_v11 = vsub.f32 %v1506_v36, %v1546_v10 }
 0x5fb   : > { %v1560_v55 = vmul.f32 1.442695, %v1556_v11 }
 0x5fd   : > { %2710 = vpow2.f32 %v1560_v55  ;;  %v2659_v55 = vld [vmem:[%s3718_s7 + $0x3] ss:$0 sm:$0xff] }
 0x600   : > { %v1549_v15 = vpop.xlane.xlu2 %1548 }
 0x601   : > { %v1557_v16 = vsub.f32 %v1509_v39, %v1549_v15  ;;  %v1724_v39 = vpop.f32.mrf.mxu0  ;;  %v2660_v15 = vld [vmem:[%s3719_s8 + $0x3] ss:$0 sm:$0xff] }
 0x603   : > { %v2711_v17 = vpop.eup %2710  ;;  %v1562_v19 = vmul.f32 1.442695, %v1557_v16 }
 0x604   : > { %v1568_v20 = vsel %vm836_vm5, %v2711_v17, 0.0 }
 0x605   : > { %2712 = vpow2.f32 %v1562_v19  ;;  %1569 = vadd.xlane.f32.xlu0 %v1568_v20 }
 0x608   : > { %v1552_v21 = vpop.xlane.xlu2 %1551 }
 0x609   : > { %v1558_v23 = vsub.f32 %v1538_v7, %v1552_v21  ;;  %v1727_v16 = vpop.f32.mrf.mxu0 }
 0x60a   : > { %v1728_v21 = vadd.f32 %v2659_v55, %v1727_v16 }
 0x60b   : > { %v2713_v24 = vpop.eup %2712  ;;  %v1564_v27 = vmul.f32 1.442695, %v1558_v23 }
 0x60c   : > { %v1571_v30 = vsel %vm836_vm5, %v2713_v24, 0.0 }
 0x60d   : > { %2714 = vpow2.f32 %v1564_v27  ;;  %1554 = vmax.xlane.f32.xlu0 %v1553_v29  ;;  %1572 = vadd.xlane.f32.xlu1 %v1571_v30  ;;  %v1737_v27 = vmul.f32 0.35355338, %v1728_v21 }
 0x613   : > { %v2715_v31 = vpop.eup %2714 }
 0x614   : > { %v1574_v0 = vsel %vm836_vm5, %v2715_v31, 0.0 }
 0x615   : > { %1575 = vadd.xlane.f32.xlu1 %v1574_v0 }
 0x678   : > { %v1570_v38 = vpop.xlane.xlu0 %1569 }
 0x679   : > { %2716 = vrcp.f32 %v1570_v38 }
 0x67f   : > { %v2717_v18 = vpop.eup %2716 }
 0x680   : > { %v1584_v32 = vmul.f32 %v2717_v18, %v2711_v17  ;;  %v1555_v35 = vpop.xlane.xlu0 %1554  ;;  %v1573_v40 = vpop.xlane.xlu1 %1572  ;;  %v1725_v17 = vadd.f32 %v2659_v55, %v1724_v39 }
 0x681   : > { %v1559_v41 = vsub.f32 %v1541_v22, %v1555_v35  ;;  %2718 = vrcp.f32 %v1573_v40  ;;  %v1730_v22 = vpop.f32.mrf.mxu0 }
 0x682   : > { %v3432_v42 = vadd.f32 %v1584_v32, %v1225_v26  ;;  %2537 = vmatmul.msk.f32.vlgmr.msrb.gmra.mxu1 %vm836_vm5, %v1584_v32  ;;  %v1736_v61 = vmul.f32 0.35355338, %v1725_v17  ;;  %v1731_v29 = vadd.f32 %v2659_v55, %v1730_v22  ;;  %v2661_v32 = vld [vmem:[%s3720_s9 + $0x3] ss:$0 sm:$0xff] }
 0x683   : > { %v1566_v43 = vmul.f32 1.442695, %v1559_v41 }
 0x685   : > { %2720 = vpow2.f32 %v1566_v43 }
 0x687   : > { %v2719_v44 = vpop.eup %2718 }
 0x688   : > { %v1576_v47 = vpop.xlane.xlu1 %1575  ;;  %v1585_v49 = vmul.f32 %v2719_v44, %v2713_v24 }
 0x689   : > { %2722 = vrcp.f32 %v1576_v47  ;;  %v1733_v30 = vpop.f32.mrf.mxu0 }
 0x68a   : > { %v3437_v50 = vadd.f32 %v1585_v49, %v1226_v46  ;;  %2538 = vmatmul.msk.f32.gmra.mxu1 %vm836_vm5, %v1585_v49 }
 0x68b   : > { %v2721_v5 = vpop.eup %2720 }
 0x68c   : > { %v1577_v3 = vsel %vm836_vm5, %v2721_v5, 0.0 }
 0x68d   : > { %1578 = vadd.xlane.f32.xlu2 %v1577_v3 }
 0x68f   : > { %v2723_v51 = vpop.eup %2722 }
 0x690   : > { %v1586_v56 = vmul.f32 %v2723_v51, %v2715_v31  ;;  %v1734_v31 = vadd.f32 %v2659_v55, %v1733_v30 }
 0x692   : > { %v3443_v1 = vadd.f32 %v1586_v56, %v1227_v52  ;;  %2539 = vmatmul.msk.f32.vlgmr.msra.gmra.mxu2 %vm836_vm5, %v1586_v56  ;;  %2560 = vmatmul.msk.f32.vlgmr.msra.gmra.mxu1 %vm545_vm0, %v3113_v45  ;;  %v1739_v0 = vmul.f32 0.35355338, %v1734_v31 }
 0x69a   : > { %2561 = vmatmul.msk.f32.gmra.mxu1 %vm545_vm0, %v3149_v25 }
 0x6ff   : > { %v1615_v36 = vpop.f32.mrf.mxu1 }
 0x700   : > { %2542 = vmatmul.msk.f32.vlgmr.msra.gmra.mxu3 %vm836_vm5, %v1615_v36  ;;  %v1579_v4 = vpop.xlane.xlu2 %1578 }
 0x701   : > { %2724 = vrcp.f32 %v1579_v4 }
 0x707   : > { %v2725_v6 = vpop.eup %2724  ;;  %v1618_v7 = vpop.f32.mrf.mxu1 }
 0x708   : > { %2543 = vmatmul.msk.f32.gmra.mxu3 %vm836_vm5, %v1618_v7  ;;  %v1587_v10 = vmul.f32 %v2725_v6, %v2721_v5 }
 0x70a   : > { %v3469_v11 = vadd.f32 %v1587_v10, %v1228_v9  ;;  %2540 = vmatmul.msk.f32.gmra.mxu2 %vm836_vm5, %v1587_v10 }
 0x70f   : > { %v1767_v19 = vpop.f32.mrf.mxu1 }
 0x710   : > { %v1768_v20 = vadd.f32 %v2660_v15, %v1767_v19 }
 0x712   : > { %2567 = vmatmul.msk.f32.vlgmr.msrb.gmra.mxu2 %vm545_vm0, %v3113_v45  ;;  %2569 = vmatpush.xpose.msk.msrb.mxu1 %vm836_vm5, %v1768_v20  ;;  %v1738_v45 = vmul.f32 0.35355338, %v1731_v29 }
 0x715   : > { %v1644_v8 = vpop.f32.mrf.mxu2  ;;  %2570 = vmatmul.msk.f32.vlgmr.msrb.gmra.mxu1 %vm836_vm5, %v1736_v61 }
 0x716   : > { %2544 = vmatmul.msk.f32.gmra.mxu3 %vm836_vm5, %v1644_v8 }
 0x717   : > { %v1770_v23 = vpop.f32.mrf.mxu1 }
 0x718   : > { %v1771_v24 = vadd.f32 %v2660_v15, %v1770_v23 }
 0x71a   : > { %2568 = vmatmul.msk.f32.gmra.mxu2 %vm545_vm0, %v3149_v25  ;;  %v1363_v25 = vadd.f32 %v3401_v60, %v3403_v62 }
 0x71b   : > { %2572 = vmatpush.xpose.msk.msra.mxu2 %vm836_vm5, %v1771_v24 }
 0x71d   : > { %2571 = vmatmul.msk.f32.gmra.mxu1 %vm836_vm5, %v1737_v27 }
 0x722   : > { %2573 = vmatmul.msk.f32.vlgmr.msra.gmra.mxu2 %vm836_vm5, %v1738_v45 }
 0x72a   : > { %2574 = vmatmul.msk.f32.gmra.mxu2 %vm836_vm5, %v1739_v0 }
 0x783   : > { %v1681_v12 = vpop.f32.mrf.mxu3 }
 0x784   : > { %v3491_v34 = vadd.f32 %v1681_v12, %v1360_v14 }
 0x78b   : > { %v1684_v37 = vpop.f32.mrf.mxu3 }
 0x78c   : > { %v3495_v38 = vadd.f32 %v1684_v37, %v1363_v25  ;;  %v2579_v25 = vld [vmem:[%s3721_s10 + $0x18] sm:$0xff] }
 0x78d   : > { %v1647_v18 = vpop.f32.mrf.mxu2  ;;  %2005 = vmatpush.msra.mxu1 %v2579_v25 }
 0x78e   : > { %2545 = vmatmul.msk.f32.gmra.mxu3 %vm836_vm5, %v1647_v18 }
 0x792   : > { %v1832_v26 = vpop.f32.mrf.mxu1 }
 0x793   : > { %v1870_v35 = vsel %vm836_vm5, %v1832_v26, -inf }
 0x794   : > { %1871 = vmax.xlane.f32.xlu0 %v1870_v35  ;;  %v2662_v35 = vld [vmem:[%s3722_s11] ss:$0 sm:$0xff] }
 0x795   : > { %v1800_v58 = vpop.f32.mrf.mxu2 }
 0x796   : > { %v1801_v59 = vadd.f32 %v2661_v32, %v1800_v58 }
 0x798   : > { %1939 = vmatpush.msrb.mxu3 %v1801_v59 }
 0x79a   : > { %v1835_v40 = vpop.f32.mrf.mxu1 }
 0x79b   : > { %v1873_v60 = vsel %vm836_vm5, %v1835_v40, -inf }
 0x79c   : > { %1874 = vmax.xlane.f32.xlu1 %v1873_v60  ;;  %v2758_v60 = vld [vmem:[%s2974_s24] sm:$0xff] }
 0x79d   : > { %v1803_v62 = vpop.f32.mrf.mxu2 }
 0x79e   : > { %v1804_v41 = vadd.f32 %v2661_v32, %v1803_v62 }
 0x7a0   : > { %1968 = vmatpush.msrb.mxu0 %v1804_v41 }
 0x7a5   : > { %v1864_v43 = vpop.f32.mrf.mxu2 }
 0x7a6   : > { %v1876_v44 = vsel %vm836_vm5, %v1864_v43, -inf }
 0x7a7   : > { %1877 = vmax.xlane.f32.xlu2 %v1876_v44 }
 0x7ad   : > { %v1867_v46 = vpop.f32.mrf.mxu2 }
 0x7ae   : > { %v1879_v47 = vsel %vm836_vm5, %v1867_v46, -inf }
 0x7af   : > { %1880 = vmax.xlane.f32.xlu0 %v1879_v47 }
 0x807   : > { %v1872_v49 = vpop.xlane.xlu0 %1871 }
 0x808   : > { %v1882_v5 = vsub.f32 %v1832_v26, %v1872_v49 }
 0x80a   : > { %v1886_v3 = vmul.f32 1.442695, %v1882_v5  ;;  %v2759_v5 = vld [vmem:[%s2974_s24 + $0x8] sm:$0xff] }
 0x80c   : > { %2726 = vpow2.f32 %v1886_v3 }
 0x80f   : > { %v1875_v51 = vpop.xlane.xlu1 %1874 }
 0x810   : > { %v1883_v52 = vsub.f32 %v1835_v40, %v1875_v51 }
 0x812   : > { %v2727_v56 = vpop.eup %2726  ;;  %v1888_v13 = vmul.f32 1.442695, %v1883_v52 }
 0x813   : > { %v1894_v53 = vsel %vm836_vm5, %v2727_v56, 0.0 }
 0x814   : > { %2728 = vpow2.f32 %v1888_v13  ;;  %1895 = vadd.xlane.f32.xlu1 %v1894_v53 }
 0x81a   : > { %v2729_v54 = vpop.eup %2728  ;;  %v1878_v57 = vpop.xlane.xlu2 %1877 }
 0x81b   : > { %v1884_v28 = vsub.f32 %v1864_v43, %v1878_v57  ;;  %v1897_v36 = vsel %vm836_vm5, %v2729_v54, 0.0  ;;  %v2760_v57 = vld [vmem:[%s2974_s24 + $0x10] sm:$0xff] }
 0x81c   : > { %1898 = vadd.xlane.f32.xlu2 %v1897_v36 }
 0x81d   : > { %v1890_v4 = vmul.f32 1.442695, %v1884_v28 }
 0x81f   : > { %2730 = vpow2.f32 %v1890_v4 }
 0x822   : > { %v1881_v39 = vpop.xlane.xlu0 %1880 }
 0x823   : > { %v1885_v6 = vsub.f32 %v1867_v46, %v1881_v39 }
 0x825   : > { %v2731_v7 = vpop.eup %2730  ;;  %v1892_v9 = vmul.f32 1.442695, %v1885_v6 }
 0x826   : > { %v1900_v10 = vsel %vm836_vm5, %v2731_v7, 0.0 }
 0x827   : > { %2732 = vpow2.f32 %v1892_v9  ;;  %1901 = vadd.xlane.f32.xlu0 %v1900_v10  ;;  %v2761_v9 = vld [vmem:[%s2974_s24 + $0x18] sm:$0xff]  ;;  %s3658_s24 = scalar_lea.vmem [#allocation2], %s2439_s16 }
 0x828   : > { %s2328_s22 = sshll.u32 %s3658_s24, 4  ;;  %s2329_s22 = int_to_ptr.vmem [resolvable:$true] %s2328_s22 }
 0x82d   : > { %v2733_v55 = vpop.eup %2732 }
 0x82e   : > { %v1903_v15 = vsel %vm836_vm5, %v2733_v55, 0.0 }
 0x82f   : > { %1904 = vadd.xlane.f32.xlu1 %v1903_v15 }
 0x887   : > { %v1896_v16 = vpop.xlane.xlu1 %1895 }
 0x888   : > { %2734 = vrcp.f32 %v1896_v16  ;;  %v2150_v16 = vld [vmem:[%s3723_s12 + $0x18] sm:$0xff] }
 0x889   : > { %2179 = vmatpush.msrb.mxu2 %v2150_v16 }
 0x88e   : > { %v2735_v17 = vpop.eup %2734 }
 0x88f   : > { %v1910_v19 = vmul.f32 %v2735_v17, %v2727_v56  ;;  %v1899_v20 = vpop.xlane.xlu2 %1898  ;;  %v2149_v17 = vld [vmem:[%s3723_s12 + $0x10] sm:$0xff] }
 0x890   : > { %2736 = vrcp.f32 %v1899_v20  ;;  %2180 = vmatpush.msrb.mxu2 %v2149_v17 }
 0x891   : > { %v1914_v61 = vadd.f32 %v1910_v19, %v3432_v42  ;;  %2575 = vmatmul.msk.f32.vlgmr.msrb.gmra.mxu3 %vm836_vm5, %v1910_v19  ;;  %v2148_v19 = vld [vmem:[%s3723_s12 + $0x8] sm:$0xff] }
 0x892   : > { %2181 = vmatpush.msrb.mxu2 %v2148_v19 }
 0x893   : > { %v2023_v8 = vmul.f32 0.25, %v1914_v61  ;;  %v2147_v61 = vld [vmem:[%s3723_s12] sm:$0xff] }
 0x894   : > { %2182 = vmatpush.msrb.mxu2 %v2147_v61 }
 0x895   : > { %2027 = vst.msk [vmem:[%s535_s26] sm:$0xff] %vm836_vm5, %v2023_v8 }
 0x896   : > { %v2737_v21 = vpop.eup %2736 }
 0x897   : > { %v1911_v22 = vmul.f32 %v2737_v21, %v2729_v54 }
 0x899   : > { %v1915_v23 = vadd.f32 %v1911_v22, %v3437_v50  ;;  %2576 = vmatmul.msk.f32.gmra.mxu3 %vm836_vm5, %v1911_v22 }
 0x89a   : > { %v1902_v24 = vpop.xlane.xlu0 %1901 }
 0x89b   : > { %v2024_v27 = vmul.f32 0.25, %v1915_v23  ;;  %2738 = vrcp.f32 %v1902_v24 }
 0x89d   : > { %2028 = vst.msk [vmem:[%s535_s26 + $0x8] sm:$0xff] %vm836_vm5, %v2024_v27 }
 0x8a1   : > { %v2739_v42 = vpop.eup %2738 }
 0x8a2   : > { %v1912_v29 = vmul.f32 %v2739_v42, %v2731_v7  ;;  %v1905_v45 = vpop.xlane.xlu1 %1904 }
 0x8a3   : > { %2740 = vrcp.f32 %v1905_v45 }
 0x8a4   : > { %v1916_v30 = vadd.f32 %v1912_v29, %v3443_v1  ;;  %2577 = vmatmul.msk.f32.vlgmr.msrb.gmra.mxu0 %vm836_vm5, %v1912_v29  ;;  %v1687_v1 = vpop.f32.mrf.mxu3 }
 0x8a6   : > { %v2025_v31 = vmul.f32 0.25, %v1916_v30 }
 0x8a8   : > { %2029 = vst.msk [vmem:[%s535_s26 + $0x10] sm:$0xff] %vm836_vm5, %v2025_v31 }
 0x8a9   : > { %v2741_v0 = vpop.eup %2740 }
 0x8aa   : > { %v1913_v50 = vmul.f32 %v2741_v0, %v2733_v55 }
 0x8ac   : > { %v1917_v14 = vadd.f32 %v1913_v50, %v3469_v11  ;;  %2578 = vmatmul.msk.f32.gmra.mxu0 %vm836_vm5, %v1913_v50  ;;  %v1690_v37 = vpop.f32.mrf.mxu3 }
 0x8ae   : > { %v2026_v12 = vmul.f32 0.25, %v1917_v14 }
 0x8b0   : > { %2030 = vst.msk [vmem:[%s535_s26 + $0x18] sm:$0xff] %vm836_vm5, %v2026_v12 }
 0x914   : > { %v1941_v18 = vpop.f32.mrf.mxu3 }
 0x915   : > { %2580 = vmatmul.msk.f32.vlgmr.msra.gmra.mxu1 %vm836_vm5, %v1941_v18 }
 0x91c   : > { %v1944_v26 = vpop.f32.mrf.mxu3 }
 0x91d   : > { %2581 = vmatmul.msk.f32.gmra.mxu1 %vm836_vm5, %v1944_v26 }
 0x921   : > { %v1970_v11 = vpop.f32.mrf.mxu0 }
 0x925   : > { %2582 = vmatmul.msk.f32.gmra.mxu1 %vm836_vm5, %v1970_v11 }
 0x929   : > { %v1973_v32 = vpop.f32.mrf.mxu0 }
 0x92d   : > { %2583 = vmatmul.msk.f32.gmra.mxu1 %vm836_vm5, %v1973_v32 }
 0x992   : > { %v2007_v58 = vpop.f32.mrf.mxu1 }
 0x993   : > { %v2019_v59 = vadd.f32 %v2007_v58, %v3491_v34  ;;  %v1366_v34 = vadd.f32 %v3405_v63, %v3407_v2  ;;  %v1696_v2 = vadd.f32 %v1690_v37, %v3409_v48 }
 0x995   : > { %v2035_v40 = vadd.f32 %v2662_v35, %v2019_v59  ;;  %v1695_v51 = vadd.f32 %v1687_v1, %v1366_v34 }
 0x997   : > { %v3538_v62 = vadd.f32 %v2758_v60, %v2035_v40 }
 0x999   : > { %v2043_v41 = vsel %vm545_vm0, %v3538_v62, 0.0  ;;  %v2059_v43 = vmul.f32 %v3538_v62, %v3538_v62 }
 0x99a   : > { %2044 = vadd.xlane.f32.xlu2 %v2043_v41  ;;  %v2010_v44 = vpop.f32.mrf.mxu1 }
 0x99b   : > { %v2020_v46 = vadd.f32 %v2010_v44, %v3495_v38  ;;  %v2063_v47 = vsel %vm545_vm0, %v2059_v43, 0.0 }
 0x99c   : > { %2064 = vadd.xlane.f32.xlu0 %v2063_v47 }
 0x99d   : > { %v2036_v49 = vadd.f32 %v2662_v35, %v2020_v46 }
 0x99f   : > { %v3549_v3 = vadd.f32 %v2759_v5, %v2036_v49 }
 0x9a1   : > { %v2046_v52 = vsel %vm545_vm0, %v3549_v3, 0.0  ;;  %v2060_v56 = vmul.f32 %v3549_v3, %v3549_v3 }
 0x9a2   : > { %2047 = vadd.xlane.f32.xlu1 %v2046_v52  ;;  %v2013_v38 = vpop.f32.mrf.mxu1 }
 0x9a3   : > { %v2021_v13 = vadd.f32 %v2013_v38, %v1695_v51  ;;  %v2066_v53 = vsel %vm545_vm0, %v2060_v56, 0.0  ;;  %v3597_v38 = vld [vmem:[%s3713_s2] ss:$0 sm:$0xff] }
 0x9a4   : > { %2067 = vadd.xlane.f32.xlu2 %v2066_v53 }
 0x9a5   : > { %v2037_v54 = vadd.f32 %v2662_v35, %v2021_v13 }
 0x9a7   : > { %v3557_v63 = vadd.f32 %v2760_v57, %v2037_v54 }
 0x9a9   : > { %v2049_v28 = vsel %vm545_vm0, %v3557_v63, 0.0  ;;  %v2061_v36 = vmul.f32 %v3557_v63, %v3557_v63 }
 0x9aa   : > { %2050 = vadd.xlane.f32.xlu0 %v2049_v28  ;;  %v2016_v4 = vpop.f32.mrf.mxu1 }
 0x9ab   : > { %v2022_v39 = vadd.f32 %v2016_v4, %v1696_v2  ;;  %v2069_v6 = vsel %vm545_vm0, %v2061_v36, 0.0  ;;  %v3603_v2 = vld [vmem:[%s3714_s3] ss:$0 sm:$0xff] }
 0x9ac   : > { %2070 = vadd.xlane.f32.xlu1 %v2069_v6 }
 0x9ad   : > { %v2038_v7 = vadd.f32 %v2662_v35, %v2022_v39 }
 0x9af   : > { %v3566_v10 = vadd.f32 %v2761_v9, %v2038_v7 }
 0x9b1   : > { %v2052_v55 = vsel %vm545_vm0, %v3566_v10, 0.0  ;;  %v2062_v48 = vmul.f32 %v3566_v10, %v3566_v10 }
 0x9b2   : > { %2053 = vadd.xlane.f32.xlu2 %v2052_v55 }
 0x9b3   : > { %v2072_v15 = vsel %vm545_vm0, %v2062_v48, 0.0 }
 0x9b4   : > { %2073 = vadd.xlane.f32.xlu0 %v2072_v15 }
 0xa0d   : > { %v2045_v20 = vpop.xlane.xlu2 %2044 }
 0xa0e   : > { %v2055_v8 = vmul.f32 %v2045_v20, %v3029_v33 }
 0xa0f   : > { %v2065_v21 = vpop.xlane.xlu0 %2064 }
 0xa10   : > { %v2079_v22 = vmul.f32 %v2055_v8, %v2055_v8  ;;  %v2075_v23 = vmul.f32 %v2065_v21, %v3029_v33  ;;  %v2087_v44 = vsub.f32 %v3538_v62, %v2055_v8 }
 0xa12   : > { %v2083_v24 = vsub.f32 %v2075_v23, %v2079_v22 }
 0xa14   : > { %v2091_v27 = vadd.f32 1e-05, %v2083_v24 }
 0xa15   : > { %v2048_v42 = vpop.xlane.xlu1 %2047 }
 0xa16   : > { %2742 = vrsqrt.f32 %v2091_v27  ;;  %v2056_v29 = vmul.f32 %v2048_v42, %v3029_v33  ;;  %vm2101_vm7 = vweird.f32 %v2091_v27 }
 0xa17   : > { %v2068_v45 = vpop.xlane.xlu2 %2067 }
 0xa18   : > { %v2080_v30 = vmul.f32 %v2056_v29, %v2056_v29  ;;  %v2076_v31 = vmul.f32 %v2068_v45, %v3029_v33  ;;  %v2088_v39 = vsub.f32 %v3549_v3, %v2056_v29 }
 0xa1a   : > { %v2084_v0 = vsub.f32 %v2076_v31, %v2080_v30 }
 0xa1c   : > { %v2743_v50 = vpop.eup %2742  ;;  %v2092_v14 = vadd.f32 1e-05, %v2084_v0  ;;  %v2663_v0 = vld [vmem:[%s3724_s13] ss:$0 sm:$0xff] }
 0xa1d   : > { %v2096_v12 = vmul.f32 %v2743_v50, %v2091_v27  ;;  %v2051_v25 = vpop.xlane.xlu0 %2050  ;;  %vm2102_vm6 = vweird.f32 %v2743_v50 }
 0xa1e   : > { %2744 = vrsqrt.f32 %v2092_v14  ;;  %v2057_v1 = vmul.f32 %v2051_v25, %v3029_v33  ;;  %vm2103_vm8 = vmor %vm2101_vm7, %vm2102_vm6  ;;  %vm2111_vm10 = vweird.f32 %v2092_v14 }
 0xa1f   : > { %v2097_v37 = vmul.f32 %v2743_v50, %v2096_v12  ;;  %v2071_v18 = vpop.xlane.xlu1 %2070 }
 0xa20   : > { %v2081_v26 = vmul.f32 %v2057_v1, %v2057_v1  ;;  %v2077_v11 = vmul.f32 %v2071_v18, %v3029_v33  ;;  %v2089_v3 = vsub.f32 %v3557_v63, %v2057_v1 }
 0xa21   : > { %v2098_v32 = vmul.f32 0.5, %v2097_v37 }
 0xa22   : > { %v2085_v35 = vsub.f32 %v2077_v11, %v2081_v26 }
 0xa23   : > { %v2099_v58 = vsub.f32 1.5, %v2098_v32 }
 0xa24   : > { %v2745_v59 = vpop.eup %2744  ;;  %v2093_v40 = vadd.f32 1e-05, %v2085_v35 }
 0xa25   : > { %v2100_v60 = vmul.f32 %v2743_v50, %v2099_v58  ;;  %v2106_v41 = vmul.f32 %v2745_v59, %v2092_v14  ;;  %v2054_v43 = vpop.xlane.xlu2 %2053  ;;  %vm2112_vm9 = vweird.f32 %v2745_v59 }
 0xa26   : > { %2746 = vrsqrt.f32 %v2093_v40  ;;  %v2058_v46 = vmul.f32 %v2054_v43, %v3029_v33  ;;  %vm2113_vm11 = vmor %vm2111_vm10, %vm2112_vm9  ;;  %vm2121_vm13 = vweird.f32 %v2093_v40 }
 0xa27   : > { %v2104_v47 = vsel %vm2103_vm8, %v2743_v50, %v2100_v60  ;;  %v2107_v49 = vmul.f32 %v2745_v59, %v2106_v41  ;;  %v2074_v34 = vpop.xlane.xlu0 %2073 }
 0xa28   : > { %v2135_v5 = vmul.f32 %v2104_v47, %v2087_v44  ;;  %v2082_v51 = vmul.f32 %v2058_v46, %v2058_v46  ;;  %v2078_v52 = vmul.f32 %v2074_v34, %v3029_v33  ;;  %v2090_v29 = vsub.f32 %v3566_v10, %v2058_v46 }
 0xa29   : > { %v2108_v56 = vmul.f32 0.5, %v2107_v49 }
 0xa2a   : > { %v2139_v13 = vmul.f32 %v3597_v38, %v2135_v5  ;;  %v2086_v62 = vsub.f32 %v2078_v52, %v2082_v51 }
 0xa2b   : > { %v2109_v53 = vsub.f32 1.5, %v2108_v56 }
 0xa2c   : > { %v2747_v54 = vpop.eup %2746  ;;  %v2094_v57 = vadd.f32 1e-05, %v2086_v62  ;;  %v2143_v28 = vadd.f32 %v3603_v2, %v2139_v13 }
 0xa2d   : > { %v2110_v36 = vmul.f32 %v2745_v59, %v2109_v53  ;;  %v2116_v4 = vmul.f32 %v2747_v54, %v2093_v40  ;;  %vm2122_vm12 = vweird.f32 %v2747_v54 }
 0xa2e   : > { %2748 = vrsqrt.f32 %v2094_v57  ;;  %2584 = vmatmul.msk.f32.vlgmr.msrb.gmra.mxu2 %vm545_vm0, %v2143_v28  ;;  %vm2123_vm14 = vmor %vm2121_vm13, %vm2122_vm12  ;;  %vm2131_vm1 = vweird.f32 %v2094_v57 }
 0xa2f   : > { %v2117_v6 = vmul.f32 %v2747_v54, %v2116_v4  ;;  %v2114_v7 = vsel %vm2113_vm11, %v2745_v59, %v2110_v36 }
 0xa30   : > { %v2136_v9 = vmul.f32 %v2114_v7, %v2088_v39 }
 0xa31   : > { %v2118_v55 = vmul.f32 0.5, %v2117_v6 }
 0xa32   : > { %v2140_v48 = vmul.f32 %v3597_v38, %v2136_v9 }
 0xa33   : > { %v2119_v15 = vsub.f32 1.5, %v2118_v55 }
 0xa34   : > { %v2749_v16 = vpop.eup %2748  ;;  %v2144_v17 = vadd.f32 %v3603_v2, %v2140_v48 }
 0xa35   : > { %v2120_v19 = vmul.f32 %v2747_v54, %v2119_v15  ;;  %v2126_v20 = vmul.f32 %v2749_v16, %v2094_v57  ;;  %vm2132_vm15 = vweird.f32 %v2749_v16 }
 0xa36   : > { %2585 = vmatmul.msk.f32.gmra.mxu2 %vm545_vm0, %v2144_v17  ;;  %vm2133_vm2 = vmor %vm2131_vm1, %vm2132_vm15 }
 0xa37   : > { %v2127_v61 = vmul.f32 %v2749_v16, %v2126_v20  ;;  %v2124_v8 = vsel %vm2123_vm14, %v2747_v54, %v2120_v19 }
 0xa38   : > { %v2137_v21 = vmul.f32 %v2124_v8, %v2089_v3 }
 0xa39   : > { %v2128_v22 = vmul.f32 0.5, %v2127_v61 }
 0xa3a   : > { %v2141_v23 = vmul.f32 %v3597_v38, %v2137_v21 }
 0xa3b   : > { %v2129_v24 = vsub.f32 1.5, %v2128_v22 }
 0xa3c   : > { %v2145_v27 = vadd.f32 %v3603_v2, %v2141_v23 }
 0xa3d   : > { %v2130_v42 = vmul.f32 %v2749_v16, %v2129_v24 }
 0xa3e   : > { %2586 = vmatmul.msk.f32.gmra.mxu2 %vm545_vm0, %v2145_v27 }
 0xa3f   : > { %v2134_v63 = vsel %vm2133_vm2, %v2749_v16, %v2130_v42 }
 0xa40   : > { %v2138_v45 = vmul.f32 %v2134_v63, %v2090_v29 }
 0xa42   : > { %v2142_v30 = vmul.f32 %v3597_v38, %v2138_v45 }
 0xa44   : > { %v2146_v31 = vadd.f32 %v3603_v2, %v2142_v30 }
 0xa46   : > { %2587 = vmatmul.msk.f32.gmra.mxu2 %vm545_vm0, %v2146_v31 }
 0xab1   : > { %v2184_v50 = vpop.f32.mrf.mxu2 }
 0xab2   : > { %v2185_v14 = vadd.f32 %v2663_v0, %v2184_v50 }
 0xab4   : > { %v2196_v12 = vadd.f32 %v2185_v14, %v2143_v28 }
 0xab6   : > { %v2200_v10 = vsel %vm545_vm0, %v2196_v12, 0.0  ;;  %v2216_v25 = vmul.f32 %v2196_v12, %v2196_v12 }
 0xab7   : > { %2201 = vadd.xlane.f32.xlu1 %v2200_v10 }
 0xab8   : > { %v2220_v1 = vsel %vm545_vm0, %v2216_v25, 0.0 }
 0xab9   : > { %v2187_v37 = vpop.f32.mrf.mxu2  ;;  %2221 = vadd.xlane.f32.xlu2 %v2220_v1 }
 0xaba   : > { %v2188_v18 = vadd.f32 %v2663_v0, %v2187_v37 }
 0xabc   : > { %v3624_v26 = vadd.f32 %v2188_v18, %v2144_v17 }
 0xabe   : > { %v2203_v11 = vsel %vm545_vm0, %v3624_v26, 0.0  ;;  %v2217_v41 = vmul.f32 %v3624_v26, %v3624_v26 }
 0xac0   : > { %v2223_v44 = vsel %vm545_vm0, %v2217_v41, 0.0 }
 0xac1   : > { %v2190_v32 = vpop.f32.mrf.mxu2  ;;  %2204 = vadd.xlane.f32.xlu2 %v2203_v11 }
 0xac2   : > { %v2191_v35 = vadd.f32 %v2663_v0, %v2190_v32 }
 0xac4   : > { %v3628_v58 = vadd.f32 %v2191_v35, %v2145_v27 }
 0xac6   : > { %v2206_v59 = vsel %vm545_vm0, %v3628_v58, 0.0  ;;  %v2218_v34 = vmul.f32 %v3628_v58, %v3628_v58 }
 0xac7   : > { %2207 = vadd.xlane.f32.xlu0 %v2206_v59 }
 0xac8   : > { %v2226_v5 = vsel %vm545_vm0, %v2218_v34, 0.0 }
 0xac9   : > { %v2193_v40 = vpop.f32.mrf.mxu2 }
 0xaca   : > { %v2194_v60 = vadd.f32 %v2663_v0, %v2193_v40 }
 0xacc   : > { %v3634_v43 = vadd.f32 %v2194_v60, %v2146_v31 }
 0xace   : > { %v2209_v46 = vsel %vm545_vm0, %v3634_v43, 0.0  ;;  %v2219_v47 = vmul.f32 %v3634_v43, %v3634_v43 }
 0xacf   : > { %2224 = vadd.xlane.f32.xlu0 %v2223_v44  ;;  %2210 = vadd.xlane.f32.xlu1 %v2209_v46 }
 0xad0   : > { %v2229_v49 = vsel %vm545_vm0, %v2219_v47, 0.0 }
 0xad1   : > { %2230 = vadd.xlane.f32.xlu2 %v2229_v49 }
 0xad7   : > { %2227 = vadd.xlane.f32.xlu1 %v2226_v5 }
 0xb2a   : > { %v2202_v51 = vpop.xlane.xlu1 %2201 }
 0xb2b   : > { %v2212_v52 = vmul.f32 %v2202_v51, %v3029_v33 }
 0xb2c   : > { %v2222_v56 = vpop.xlane.xlu2 %2221 }
 0xb2d   : > { %v2236_v13 = vmul.f32 %v2212_v52, %v2212_v52  ;;  %v2232_v62 = vmul.f32 %v2222_v56, %v3029_v33  ;;  %v2244_v16 = vsub.f32 %v2196_v12, %v2212_v52 }
 0xb2f   : > { %v2240_v53 = vsub.f32 %v2232_v62, %v2236_v13 }
 0xb31   : > { %v2248_v54 = vadd.f32 1e-05, %v2240_v53 }
 0xb33   : > { %2750 = vrsqrt.f32 %v2248_v54  ;;  %vm2258_vm4 = vweird.f32 %v2248_v54 }
 0xb34   : > { %v2205_v39 = vpop.xlane.xlu2 %2204 }
 0xb35   : > { %v2213_v7 = vmul.f32 %v2205_v39, %v3029_v33 }
 0xb37   : > { %v2237_v17 = vmul.f32 %v2213_v7, %v2213_v7  ;;  %v2245_v60 = vsub.f32 %v3624_v26, %v2213_v7 }
 0xb39   : > { %v2751_v57 = vpop.eup %2750 }
 0xb3a   : > { %v2253_v28 = vmul.f32 %v2751_v57, %v2248_v54  ;;  %v2208_v36 = vpop.xlane.xlu0 %2207  ;;  %vm2259_vm3 = vweird.f32 %v2751_v57 }
 0xb3b   : > { %vm2260_vm5 = vmor %vm2258_vm4, %vm2259_vm3  ;;  %v2214_v27 = vmul.f32 %v2208_v36, %v3029_v33 }
 0xb3c   : > { %v2254_v4 = vmul.f32 %v2751_v57, %v2253_v28 }
 0xb3d   : > { %v2238_v31 = vmul.f32 %v2214_v27, %v2214_v27 }
 0xb3e   : > { %v2255_v6 = vmul.f32 0.5, %v2254_v4 }
 0xb40   : > { %v2256_v9 = vsub.f32 1.5, %v2255_v6 }
 0xb42   : > { %v2257_v55 = vmul.f32 %v2751_v57, %v2256_v9  ;;  %v2225_v48 = vpop.xlane.xlu0 %2224  ;;  %v2211_v15 = vpop.xlane.xlu1 %2210 }
 0xb43   : > { %v2233_v19 = vmul.f32 %v2225_v48, %v3029_v33  ;;  %v2215_v20 = vmul.f32 %v2211_v15, %v3029_v33 }
 0xb44   : > { %v2261_v3 = vsel %vm2260_vm5, %v2751_v57, %v2257_v55  ;;  %v2231_v61 = vpop.xlane.xlu2 %2230 }
 0xb45   : > { %v2292_v8 = vmul.f32 %v2261_v3, %v2244_v16  ;;  %v2241_v21 = vsub.f32 %v2233_v19, %v2237_v17  ;;  %v2239_v22 = vmul.f32 %v2215_v20, %v2215_v20  ;;  %v2235_v23 = vmul.f32 %v2231_v61, %v3029_v33 }
 0xb46   : > { %v2247_v34 = vsub.f32 %v3634_v43, %v2215_v20  ;;  %v2246_v43 = vsub.f32 %v3628_v58, %v2214_v27 }
 0xb47   : > { %v2296_v24 = vmul.f32 %v3597_v38, %v2292_v8  ;;  %v2249_v42 = vadd.f32 1e-05, %v2241_v21  ;;  %v2243_v29 = vsub.f32 %v2235_v23, %v2239_v22 }
 0xb49   : > { %v2300_v63 = vadd.f32 %v3603_v2, %v2296_v24  ;;  %2752 = vrsqrt.f32 %v2249_v42  ;;  %v2251_v45 = vadd.f32 1e-05, %v2243_v29  ;;  %vm2268_vm7 = vweird.f32 %v2249_v42 }
 0xb4a   : > { %v2228_v30 = vpop.xlane.xlu1 %2227 }
 0xb4b   : > { %v2234_v0 = vmul.f32 %v2228_v30, %v3029_v33  ;;  %2304 = vst.msk [vmem:[%s3658_s24] sm:$0xff] %vm545_vm0, %v2300_v63  ;;  %2754 = vrsqrt.f32 %v2251_v45  ;;  %vm2288_vm10 = vweird.f32 %v2251_v45 }
 0xb4d   : > { %v2242_v50 = vsub.f32 %v2234_v0, %v2238_v31 }
 0xb4f   : > { %v2753_v14 = vpop.eup %2752  ;;  %v2250_v12 = vadd.f32 1e-05, %v2242_v50 }
 0xb50   : > { %v2263_v10 = vmul.f32 %v2753_v14, %v2249_v42  ;;  %vm2269_vm6 = vweird.f32 %v2753_v14 }
 0xb51   : > { %2756 = vrsqrt.f32 %v2250_v12  ;;  %v2755_v25 = vpop.eup %2754  ;;  %vm2270_vm8 = vmor %vm2268_vm7, %vm2269_vm6  ;;  %vm2278_vm13 = vweird.f32 %v2250_v12 }
 0xb52   : > { %v2264_v1 = vmul.f32 %v2753_v14, %v2263_v10  ;;  %v2283_v37 = vmul.f32 %v2755_v25, %v2251_v45  ;;  %vm2289_vm9 = vweird.f32 %v2755_v25 }
 0xb53   : > { %vm2290_vm11 = vmor %vm2288_vm10, %vm2289_vm9 }
 0xb54   : > { %v2265_v18 = vmul.f32 0.5, %v2264_v1  ;;  %v2284_v11 = vmul.f32 %v2755_v25, %v2283_v37 }
 0xb56   : > { %v2266_v32 = vsub.f32 1.5, %v2265_v18  ;;  %v2285_v33 = vmul.f32 0.5, %v2284_v11 }
 0xb57   : > { %v2757_v35 = vpop.eup %2756 }
 0xb58   : > { %v2267_v59 = vmul.f32 %v2753_v14, %v2266_v32  ;;  %v2273_v40 = vmul.f32 %v2757_v35, %v2250_v12  ;;  %v2286_v41 = vsub.f32 1.5, %v2285_v33  ;;  %vm2279_vm12 = vweird.f32 %v2757_v35 }
 0xb59   : > { %vm2280_vm14 = vmor %vm2278_vm13, %vm2279_vm12 }
 0xb5a   : > { %v2271_v44 = vsel %vm2270_vm8, %v2753_v14, %v2267_v59  ;;  %v2274_v46 = vmul.f32 %v2757_v35, %v2273_v40  ;;  %v2287_v49 = vmul.f32 %v2755_v25, %v2286_v41 }
 0xb5b   : > { %v2293_v47 = vmul.f32 %v2271_v44, %v2245_v60 }
 0xb5c   : > { %v2275_v5 = vmul.f32 0.5, %v2274_v46  ;;  %v2291_v52 = vsel %vm2290_vm11, %v2755_v25, %v2287_v49 }
 0xb5d   : > { %v2297_v51 = vmul.f32 %v3597_v38, %v2293_v47  ;;  %v2295_v56 = vmul.f32 %v2291_v52, %v2247_v34 }
 0xb5e   : > { %v2276_v26 = vsub.f32 1.5, %v2275_v5 }
 0xb5f   : > { %v2301_v13 = vadd.f32 %v3603_v2, %v2297_v51  ;;  %v2299_v62 = vmul.f32 %v3597_v38, %v2295_v56 }
 0xb60   : > { %v2277_v53 = vmul.f32 %v2757_v35, %v2276_v26 }
 0xb61   : > { %2305 = vst.msk [vmem:[%s3658_s24 + $0x8] sm:$0xff] %vm545_vm0, %v2301_v13  ;;  %v2303_v54 = vadd.f32 %v3603_v2, %v2299_v62 }
 0xb62   : > { %v2281_v57 = vsel %vm2280_vm14, %v2757_v35, %v2277_v53 }
 0xb63   : > { %v2294_v28 = vmul.f32 %v2281_v57, %v2246_v43  ;;  %2307 = vst.msk [vmem:[%s3658_s24 + $0x18] sm:$0xff] %vm545_vm0, %v2303_v54 }
 0xb65   : > { %v2298_v36 = vmul.f32 %v3597_v38, %v2294_v28 }
 0xb67   : > { %v2302_v4 = vadd.f32 %v3603_v2, %v2298_v36 }
 0xb69   : > { %2306 = vst.msk [vmem:[%s3658_s24 + $0x10] sm:$0xff] %vm545_vm0, %v2302_v4 }
 0xb6a   : > { %2791 = shalt.err (!%p2788_p3)
}
 0xb6b   : > { %s2829_s27 = smov 128   ;;  %s2830_s24 = smov 8  }
 0xb6c   : > { %2606 = dma.vmem_to_hbm [thread:$0]  (%p2949_p5), %s2329_s22, 512, %s2331_s0, %s2309_s1, %s2829_s27, %s2829_s27, %s2830_s24  }
 0xb6d PF: > { %p2612_p4 = scmp.ge.s32.totalorder %s2826_s21, 2  ;;  %s2349_s20 = sand.u32 1, %s2814_s18  }
 0xb6e   : > { %s2350_s16 = scalar_lea.sflag [#allocation3], %s2349_s20 }
 0xb6f   : > { %p2609_p7 = pnand %p2612_p4, %p2953_p6 }
 0xb71   : > { %p2610_p8 = pneg %p2609_p7 }
 0xb73   : > { %2809 = dma.done.wait (%p2610_p8), %s2350_s16, 512  }
 0xb74   : > { %2811 = vsyncadd (%p2610_p8), %s2350_s16, 4294966784  ;;  %s3744_s21 = sld [smem:[#allocation6_spill]]  ;;  %s3747_s18 = smov %s2818_s19 }
 0xb75   : > { %s3745_s29 = sld [smem:[#allocation5_spill]] }
 0xb76   : > { %s3746_s20 = sld [smem:[#allocation7_spill]] }
 0xb7a   : > { %p26_p9 = scmp.ge.s32.totalorder %s3744_s21, 4  }
 0xb7b   : > { %s3748_s19 = smov %s3745_s29 }
 0xb7c   :  { %28 = sbr.rel (!%p26_p9) target bundleno = 6 (0x6), region = 147 }
 0xb81   :  { %2365 = vsyncpa [#allocation3], 1 }
 0xb82   :  { %2367 = vsyncpa [#allocation3 + $0x1], 1 }

</bundles_post_ra>
